<compile_context>
chip_gen: v7x
topology: tpu7x:2x2x1
jax: 0.10.0
libtpu: 0.0.40
codegen_flags: <defaults>
</compile_context>

<pallas_src>
import math

import jax
import jax.numpy as jnp
import numpy as np
from jax.experimental import pallas as pl
from jax.experimental.pallas import tpu as pltpu


# --------------------------------------------------------------------------- #
# Phase-space ("space-to-depth to base grid") layout helpers (XLA-side, cheap).
# --------------------------------------------------------------------------- #

def _to_rep(x, base):
    """(N, C, H, W) -> (N, C*f*f, base*base).

    rep[n, (c*f + ay)*f + ax, Y*base + X] == x[n, c, Y*f + ay, X*f + ax]."""
    n, c, h, w = x.shape
    f = h // base
    x = x.reshape(n, c, base, f, base, f)
    x = x.transpose(0, 1, 3, 5, 2, 4)               # (n, c, ay, ax, Y, X)
    return x.reshape(n, c * f * f, base * base)


def _from_rep(y, base, c, h, w):
    n = y.shape[0]
    f = h // base
    y = y.reshape(n, c, f, f, base, base)           # (n, c, ay, ax, Y, X)
    y = y.transpose(0, 1, 4, 2, 5, 3)               # (n, c, Y, ay, X, ax)
    return y.reshape(n, c, h, w)


# --------------------------------------------------------------------------- #
# Init-time rewrite of a Conv2d / ConvTranspose2d into base-grid tap matmuls.
# --------------------------------------------------------------------------- #

def _phase_taps(layer, h_in, h_out, base):
    """Return ({(dy,dx): W_rep (c_out_rep, c_in_rep)}, b_rep (c_out_rep,))."""
    transpose = layer.type == "ConvTranspose2d"
    w = np.asarray(layer.weight, dtype=np.float32)
    bias = np.asarray(layer.bias, dtype=np.float32)
    s, p, k = layer.stride, layer.padding, layer.k
    f_in, f_out = h_in // base, h_out // base
    if transpose:
        c_in, c_out = w.shape[0], w.shape[1]
        assert f_out == f_in * s, "unsupported ConvTranspose geometry"
    else:
        c_out, c_in = w.shape[0], w.shape[1]
        assert f_in == f_out * s, "unsupported Conv geometry"
    c_in_rep, c_out_rep = c_in * f_in * f_in, c_out * f_out * f_out

    taps = {}

    def add(dy, dx, ro, ri, val):
        key = (dy, dx)
        if key not in taps:
            taps[key] = np.zeros((c_out_rep, c_in_rep), np.float32)
        taps[key][ro, ri] += val

    for co in range(c_out):
        for ay in range(f_out):
            for ax in range(f_out):
                ro = (co * f_out + ay) * f_out + ax
                for ci in range(c_in):
                    for ki in range(k):
                        for kj in range(k):
                            if not transpose:
                                # in row = (Y*f_out+ay)*s + ki - p
                                #        = Y*f_in + (ay*s + ki - p)
                                dy, by = divmod(ay * s + ki - p, f_in)
                                dx, bx = divmod(ax * s + kj - p, f_in)
                                val = w[co, ci, ki, kj]
                            else:
                                # out row oy = iy*s - p + ki, oy = Y*f_out+ay
                                #   => iy = Y*f_in + (ay + p - ki)/s
                                ny, nx = ay + p - ki, ax + p - kj
                                if ny % s or nx % s:
                                    continue
                                dy, by = divmod(ny // s, f_in)
                                dx, bx = divmod(nx // s, f_in)
                                val = w[ci, co, ki, kj]
                            ri = (ci * f_in + by) * f_in + bx
                            add(dy, dx, ro, ri, val)

    b_rep = np.repeat(bias, f_out * f_out)
    return taps, b_rep, c_in_rep, c_out_rep


def _shift_matrices(shifts, base):
    """T[p, q] = 1 iff base cell p == (cell q shifted by (dy,dx)) and in range.
    x_shifted = x @ T implements the shift with implicit zero padding."""
    bm = base * base
    t = np.zeros((len(shifts), bm, bm), np.float32)
    for i, (dy, dx) in enumerate(shifts):
        for yq in range(base):
            for xq in range(base):
                yp, xp = yq + dy, xq + dx
                if 0 <= yp < base and 0 <= xp < base:
                    t[i, yp * base + xp, yq * base + xq] = 1.0
    return t


_CONV_TYPES = ("Conv2d", "ConvTranspose2d")
_ACT_TYPES = {"ReLU": "relu", "Sigmoid": "sigmoid"}


def _build_plan(layers, in_shape):
    """Static-shape trace of the stack + phase-space weights for every layer."""
    _, c, h, w = in_shape
    if h != w:
        raise NotImplementedError("square spatial inputs only")
    shapes = [(c, h, w)]
    for layer in layers:
        if layer.type in _CONV_TYPES:
            h, w = layer.out_hw(h, w)
            c = layer.c_out
        shapes.append((c, h, w))
    base = min(s[1] for s in shapes)
    for (_, hh, ww) in shapes:
        if hh != ww or hh % base:
            raise NotImplementedError("spatial sizes must be square multiples "
                                      "of the base grid")

    plan, shift_keys = [], []
    ci, hi, wi = shapes[0]
    for layer in layers:
        if layer.type in _CONV_TYPES:
            ho, wo = layer.out_hw(hi, wi)
            taps, b_rep, c_in_rep, c_out_rep = _phase_taps(layer, hi, ho, base)
            keys = sorted(taps.keys())
            sids = []
            for kk in keys:
                if kk not in shift_keys:
                    shift_keys.append(kk)
                sids.append(shift_keys.index(kk))
            w_rep = jnp.asarray(np.stack([taps[kk] for kk in keys], axis=0))
            b_bcast = jnp.asarray(np.tile(b_rep[:, None], (1, base * base)))
            plan.append(dict(w_rep=w_rep, b_rep=b_bcast, shift_ids=sids,
                             acts=[], c_in_rep=c_in_rep, c_out_rep=c_out_rep))
            ci, hi, wi = layer.c_out, ho, wo
        elif layer.type in _ACT_TYPES:
            if not plan:
                raise NotImplementedError("activation before first conv layer")
            plan[-1]["acts"].append(_ACT_TYPES[layer.type])
        else:
            raise NotImplementedError(f"unsupported layer type {layer.type}")
    t_all = jnp.asarray(_shift_matrices(shift_keys, base))
    return plan, t_all, base, (ci, hi, wi)


# --------------------------------------------------------------------------- #
# The fused Pallas kernel: the whole layer stack, per grid step = one image.
# --------------------------------------------------------------------------- #

def _make_fused_kernel(plan):
    def kernel(x_ref, t_ref, *rest):
        o_ref = rest[-1]
        act = x_ref[0]                                    # (c0_rep, BM) f32
        for li, lm in enumerate(plan):
            w_ref, b_ref = rest[2 * li], rest[2 * li + 1]
            acc = b_ref[...]                              # bias pre-broadcast
            for ti, sid in enumerate(lm["shift_ids"]):
                x_sh = jnp.dot(act, t_ref[sid],
                               preferred_element_type=jnp.float32)
                acc = acc + jnp.dot(w_ref[ti], x_sh,
                                    preferred_element_type=jnp.float32)
            for a in lm["acts"]:
                if a == "relu":
                    acc = jnp.maximum(acc, 0.0)
                elif a == "sigmoid":
                    # exact sigmoid (keeps the [0, 1] output-range contract)
                    acc = 1.0 / (1.0 + jnp.exp(-acc))
            act = acc
        o_ref[0] = act.astype(o_ref.dtype)
    return kernel


def _fused_forward(x_rep, plan, t_all, base, n):
    bm = base * base
    c0 = plan[0]["c_in_rep"]
    cl = plan[-1]["c_out_rep"]

    in_specs = [pl.BlockSpec((1, c0, bm), lambda i: (i, 0, 0)),
                pl.BlockSpec(t_all.shape, lambda i: (0, 0, 0))]
    operands = [x_rep, t_all]
    for lm in plan:
        in_specs.append(pl.BlockSpec(lm["w_rep"].shape, lambda i: (0, 0, 0)))
        in_specs.append(pl.BlockSpec(lm["b_rep"].shape, lambda i: (0, 0)))
        operands += [lm["w_rep"], lm["b_rep"]]

    return pl.pallas_call(
        _make_fused_kernel(plan),
        out_shape=jax.ShapeDtypeStruct((n, cl, bm), jnp.float32),
        grid=(n,),                                        # batch -> 2 TC on v7x
        in_specs=in_specs,
        out_specs=pl.BlockSpec((1, cl, bm), lambda i: (i, 0, 0)),
        compiler_params=pltpu.CompilerParams(
            dimension_semantics=("parallel",),
            vmem_limit_bytes=32 * 1024 * 1024),           # << 64 MiB (v7x safe)
    )(*operands)


# --------------------------------------------------------------------------- #
# Layer objects mirroring the PyTorch modules.
# --------------------------------------------------------------------------- #

class Conv2dLayer:
    type = "Conv2d"

    def __init__(self, key, c_in, c_out, k, stride=1, padding=0):
        self.c_in, self.c_out, self.k = c_in, c_out, k
        self.stride, self.padding = stride, padding
        bound = 1.0 / math.sqrt(c_in * k * k)
        kw_, kb_ = jax.random.split(key)
        self.weight = jax.random.uniform(kw_, (c_out, c_in, k, k),
                                         minval=-bound, maxval=bound,
                                         dtype=jnp.float32)
        self.bias = jax.random.uniform(kb_, (c_out,), minval=-bound,
                                       maxval=bound, dtype=jnp.float32)

    def out_hw(self, h, w):
        oh = (h + 2 * self.padding - self.k) // self.stride + 1
        ow = (w + 2 * self.padding - self.k) // self.stride + 1
        return oh, ow

    def forward(self, x):
        return Sequential(self).forward(x)


class ConvTranspose2dLayer:
    type = "ConvTranspose2d"

    def __init__(self, key, c_in, c_out, k, stride=1, padding=0,
                 output_padding=0):
        self.c_in, self.c_out, self.k = c_in, c_out, k
        self.stride, self.padding, self.output_padding = (stride, padding,
                                                          output_padding)
        bound = 1.0 / math.sqrt(c_out * k * k)
        kw_, kb_ = jax.random.split(key)
        self.weight = jax.random.uniform(kw_, (c_in, c_out, k, k),
                                         minval=-bound, maxval=bound,
                                         dtype=jnp.float32)
        self.bias = jax.random.uniform(kb_, (c_out,), minval=-bound,
                                       maxval=bound, dtype=jnp.float32)

    def out_hw(self, h, w):
        oh = (h - 1) * self.stride - 2 * self.padding + self.k + self.output_padding
        ow = (w - 1) * self.stride - 2 * self.padding + self.k + self.output_padding
        return oh, ow

    def forward(self, x):
        return Sequential(self).forward(x)


class ReLULayer:
    type = "ReLU"

    def forward(self, x):
        # Standalone use only; inside Sequential this is fused into the kernel.
        return jnp.maximum(x, 0.0)


class SigmoidLayer:
    type = "Sigmoid"

    def forward(self, x):
        return jax.nn.sigmoid(x)


class Sequential:
    """Mirrors Miniproject2 Sequential: same forward math as chaining
    layer.forward calls, but executed as ONE fused Pallas kernel with all
    intermediate activations resident in VMEM."""

    def __init__(self, *args):
        self.layers = [layer for layer in args]
        self._cache = {}

    def forward(self, input):
        self.input = input
        key = tuple(input.shape)
        if key not in self._cache:
            self._cache[key] = _build_plan(self.layers, key)
        plan, t_all, base, (oc, oh, ow) = self._cache[key]
        n = input.shape[0]
        x_rep = _to_rep(input.astype(jnp.float32), base)
        y_rep = _fused_forward(x_rep, plan, t_all, base, n)
        self.output = _from_rep(y_rep, base, oc, oh, ow)
        return self.output

    def params(self):
        return self.layers

    # TODO(synk): backward / zero_grad / load_para / load are training-time
    # state management with no forward-pass Pallas equivalent; not implemented.


# --------------------------------------------------------------------------- #
# Pure-JAX reference (exact, f32) for in-script verification.
# --------------------------------------------------------------------------- #

def _reference_forward(layers, x):
    out = x.astype(jnp.float32)
    hp = jax.lax.Precision.HIGHEST
    for layer in layers:
        if layer.type == "Conv2d":
            out = jax.lax.conv_general_dilated(
                out, layer.weight, (layer.stride, layer.stride),
                [(layer.padding, layer.padding)] * 2,
                dimension_numbers=("NCHW", "OIHW", "NCHW"), precision=hp)
            out = out + layer.bias[None, :, None, None]
        elif layer.type == "ConvTranspose2d":
            w = jnp.flip(layer.weight, axis=(2, 3)).transpose(1, 0, 2, 3)
            lo = layer.k - 1 - layer.padding
            hi = lo + layer.output_padding
            out = jax.lax.conv_general_dilated(
                out, w, (1, 1), [(lo, hi)] * 2,
                lhs_dilation=(layer.stride, layer.stride),
                dimension_numbers=("NCHW", "OIHW", "NCHW"), precision=hp)
            out = out + layer.bias[None, :, None, None]
        elif layer.type == "ReLU":
            out = jnp.maximum(out, 0.0)
        elif layer.type == "Sigmoid":
            out = jax.nn.sigmoid(out)
    return out


# ---------------------------------- main ----------------------------------- #

if __name__ == "__main__":
    key = jax.random.PRNGKey(0)
    k_in, k1, k2, k3, k4 = jax.random.split(key, 5)

    # Input: NCHW, batch=2, channels=3, spatial=16x16
    x = jax.random.normal(k_in, (2, 3, 16, 16), dtype=jnp.float32)

    hidden = 16
    model = Sequential(
        Conv2dLayer(k1, 3, hidden, 3, stride=2, padding=1),
        ReLULayer(),
        Conv2dLayer(k2, hidden, hidden, 3, stride=2, padding=1),
        ReLULayer(),
        ConvTranspose2dLayer(k3, hidden, hidden, 3, stride=2, padding=1,
                             output_padding=1),
        ReLULayer(),
        ConvTranspose2dLayer(k4, hidden, 3, 3, stride=2, padding=1,
                             output_padding=1),
        SigmoidLayer(),
    )

    forward = jax.jit(model.forward)     # one executable, one pallas_call
    out = jax.block_until_ready(forward(x))

    assert out.shape == (2, 3, 16, 16), out.shape
    assert bool(jnp.all(jnp.isfinite(out)))
    assert bool(jnp.all((out >= 0.0) & (out <= 1.0)))   # sigmoid output range

    ref = _reference_forward(model.layers, x)
    err = float(jnp.max(jnp.abs(out - ref)))
    assert err < 5e-3, f"max |kernel - reference| = {err}"

    print("KERNEL_OK")
</pallas_src>

<mosaic_0001>
module attributes {stable_mosaic.version = 11 : i64} {
  func.func @kernel(%arg0: i32, %arg1: memref<1x48x16xf32, #tpu.memory_space<vmem>>, %arg2: memref<7x16x16xf32, #tpu.memory_space<vmem>>, %arg3: memref<4x64x48xf32, #tpu.memory_space<vmem>>, %arg4: memref<64x16xf32, #tpu.memory_space<vmem>>, %arg5: memref<4x16x64xf32, #tpu.memory_space<vmem>>, %arg6: memref<16x16xf32, #tpu.memory_space<vmem>>, %arg7: memref<4x64x16xf32, #tpu.memory_space<vmem>>, %arg8: memref<64x16xf32, #tpu.memory_space<vmem>>, %arg9: memref<4x48x64xf32, #tpu.memory_space<vmem>>, %arg10: memref<48x16xf32, #tpu.memory_space<vmem>>, %arg11: memref<1x48x16xf32, #tpu.memory_space<vmem>>) attributes {dimension_semantics = [#tpu.dimension_semantics<parallel>], iteration_bounds = array<i64: 2>, scalar_prefetch = 0 : i64, scratch_operands = 0 : i64, tpu.core_type = #tpu.core_type<tc>, window_params = [{transform_indices = @transform_0, window_bounds = array<i64: 1, 48, 16>}, {pipeline_mode = #tpu.pipeline_mode<synchronous>, transform_indices = @transform_1, window_bounds = array<i64: 7, 16, 16>}, {pipeline_mode = #tpu.pipeline_mode<synchronous>, transform_indices = @transform_2, window_bounds = array<i64: 4, 64, 48>}, {pipeline_mode = #tpu.pipeline_mode<synchronous>, transform_indices = @transform_3, window_bounds = array<i64: 64, 16>}, {pipeline_mode = #tpu.pipeline_mode<synchronous>, transform_indices = @transform_4, window_bounds = array<i64: 4, 16, 64>}, {pipeline_mode = #tpu.pipeline_mode<synchronous>, transform_indices = @transform_5, window_bounds = array<i64: 16, 16>}, {pipeline_mode = #tpu.pipeline_mode<synchronous>, transform_indices = @transform_6, window_bounds = array<i64: 4, 64, 16>}, {pipeline_mode = #tpu.pipeline_mode<synchronous>, transform_indices = @transform_7, window_bounds = array<i64: 64, 16>}, {pipeline_mode = #tpu.pipeline_mode<synchronous>, transform_indices = @transform_8, window_bounds = array<i64: 4, 48, 64>}, {pipeline_mode = #tpu.pipeline_mode<synchronous>, transform_indices = @transform_9, window_bounds = array<i64: 48, 16>}, {transform_indices = @transform_10, window_bounds = array<i64: 1, 48, 16>}]} {
    %c0 = arith.constant 0 : index
    %c0_0 = arith.constant 0 : index
    %c0_1 = arith.constant 0 : index
    %0 = vector.load %arg1[%c0, %c0_0, %c0_1] : memref<1x48x16xf32, #tpu.memory_space<vmem>>, vector<1x48x16xf32>
    %1 = vector.shape_cast %0 : vector<1x48x16xf32> to vector<48x16xf32>
    %c0_2 = arith.constant 0 : index
    %c0_3 = arith.constant 0 : index
    %2 = vector.load %arg4[%c0_2, %c0_3] : memref<64x16xf32, #tpu.memory_space<vmem>>, vector<64x16xf32>
    %c0_4 = arith.constant 0 : index
    %c0_5 = arith.constant 0 : index
    %c0_6 = arith.constant 0 : index
    %3 = vector.load %arg2[%c0_4, %c0_5, %c0_6] : memref<7x16x16xf32, #tpu.memory_space<vmem>>, vector<1x16x16xf32>
    %4 = vector.shape_cast %3 : vector<1x16x16xf32> to vector<16x16xf32>
    %cst = arith.constant dense<0.000000e+00> : vector<48x16xf32>
    %5 = tpu.matmul %1, %4, %cst {dimension_numbers = #tpu.dot_dimension_numbers<[1], [0], [0], [1], [0, 0, 1, 1], [], []>} : vector<48x16xf32>, vector<16x16xf32>, vector<48x16xf32> -> vector<48x16xf32>
    %c0_7 = arith.constant 0 : index
    %c0_8 = arith.constant 0 : index
    %c0_9 = arith.constant 0 : index
    %6 = vector.load %arg3[%c0_7, %c0_8, %c0_9] : memref<4x64x48xf32, #tpu.memory_space<vmem>>, vector<1x64x48xf32>
    %7 = vector.shape_cast %6 : vector<1x64x48xf32> to vector<64x48xf32>
    %cst_10 = arith.constant dense<0.000000e+00> : vector<64x16xf32>
    %8 = tpu.matmul %7, %5, %cst_10 {dimension_numbers = #tpu.dot_dimension_numbers<[1], [0], [0], [1], [0, 0, 1, 1], [], []>} : vector<64x48xf32>, vector<48x16xf32>, vector<64x16xf32> -> vector<64x16xf32>
    %9 = arith.addf %2, %8 : vector<64x16xf32>
    %c1 = arith.constant 1 : index
    %c0_11 = arith.constant 0 : index
    %c0_12 = arith.constant 0 : index
    %10 = vector.load %arg2[%c1, %c0_11, %c0_12] : memref<7x16x16xf32, #tpu.memory_space<vmem>>, vector<1x16x16xf32>
    %11 = vector.shape_cast %10 : vector<1x16x16xf32> to vector<16x16xf32>
    %cst_13 = arith.constant dense<0.000000e+00> : vector<48x16xf32>
    %12 = tpu.matmul %1, %11, %cst_13 {dimension_numbers = #tpu.dot_dimension_numbers<[1], [0], [0], [1], [0, 0, 1, 1], [], []>} : vector<48x16xf32>, vector<16x16xf32>, vector<48x16xf32> -> vector<48x16xf32>
    %c1_14 = arith.constant 1 : index
    %c0_15 = arith.constant 0 : index
    %c0_16 = arith.constant 0 : index
    %13 = vector.load %arg3[%c1_14, %c0_15, %c0_16] : memref<4x64x48xf32, #tpu.memory_space<vmem>>, vector<1x64x48xf32>
    %14 = vector.shape_cast %13 : vector<1x64x48xf32> to vector<64x48xf32>
    %cst_17 = arith.constant dense<0.000000e+00> : vector<64x16xf32>
    %15 = tpu.matmul %14, %12, %cst_17 {dimension_numbers = #tpu.dot_dimension_numbers<[1], [0], [0], [1], [0, 0, 1, 1], [], []>} : vector<64x48xf32>, vector<48x16xf32>, vector<64x16xf32> -> vector<64x16xf32>
    %16 = arith.addf %9, %15 : vector<64x16xf32>
    %c2 = arith.constant 2 : index
    %c0_18 = arith.constant 0 : index
    %c0_19 = arith.constant 0 : index
    %17 = vector.load %arg2[%c2, %c0_18, %c0_19] : memref<7x16x16xf32, #tpu.memory_space<vmem>>, vector<1x16x16xf32>
    %18 = vector.shape_cast %17 : vector<1x16x16xf32> to vector<16x16xf32>
    %cst_20 = arith.constant dense<0.000000e+00> : vector<48x16xf32>
    %19 = tpu.matmul %1, %18, %cst_20 {dimension_numbers = #tpu.dot_dimension_numbers<[1], [0], [0], [1], [0, 0, 1, 1], [], []>} : vector<48x16xf32>, vector<16x16xf32>, vector<48x16xf32> -> vector<48x16xf32>
    %c2_21 = arith.constant 2 : index
    %c0_22 = arith.constant 0 : index
    %c0_23 = arith.constant 0 : index
    %20 = vector.load %arg3[%c2_21, %c0_22, %c0_23] : memref<4x64x48xf32, #tpu.memory_space<vmem>>, vector<1x64x48xf32>
    %21 = vector.shape_cast %20 : vector<1x64x48xf32> to vector<64x48xf32>
    %cst_24 = arith.constant dense<0.000000e+00> : vector<64x16xf32>
    %22 = tpu.matmul %21, %19, %cst_24 {dimension_numbers = #tpu.dot_dimension_numbers<[1], [0], [0], [1], [0, 0, 1, 1], [], []>} : vector<64x48xf32>, vector<48x16xf32>, vector<64x16xf32> -> vector<64x16xf32>
    %23 = arith.addf %16, %22 : vector<64x16xf32>
    %c3 = arith.constant 3 : index
    %c0_25 = arith.constant 0 : index
    %c0_26 = arith.constant 0 : index
    %24 = vector.load %arg2[%c3, %c0_25, %c0_26] : memref<7x16x16xf32, #tpu.memory_space<vmem>>, vector<1x16x16xf32>
    %25 = vector.shape_cast %24 : vector<1x16x16xf32> to vector<16x16xf32>
    %cst_27 = arith.constant dense<0.000000e+00> : vector<48x16xf32>
    %26 = tpu.matmul %1, %25, %cst_27 {dimension_numbers = #tpu.dot_dimension_numbers<[1], [0], [0], [1], [0, 0, 1, 1], [], []>} : vector<48x16xf32>, vector<16x16xf32>, vector<48x16xf32> -> vector<48x16xf32>
    %c3_28 = arith.constant 3 : index
    %c0_29 = arith.constant 0 : index
    %c0_30 = arith.constant 0 : index
    %27 = vector.load %arg3[%c3_28, %c0_29, %c0_30] : memref<4x64x48xf32, #tpu.memory_space<vmem>>, vector<1x64x48xf32>
    %28 = vector.shape_cast %27 : vector<1x64x48xf32> to vector<64x48xf32>
    %cst_31 = arith.constant dense<0.000000e+00> : vector<64x16xf32>
    %29 = tpu.matmul %28, %26, %cst_31 {dimension_numbers = #tpu.dot_dimension_numbers<[1], [0], [0], [1], [0, 0, 1, 1], [], []>} : vector<64x48xf32>, vector<48x16xf32>, vector<64x16xf32> -> vector<64x16xf32>
    %30 = arith.addf %23, %29 : vector<64x16xf32>
    %cst_32 = arith.constant 0.000000e+00 : f32
    %31 = vector.broadcast %cst_32 : f32 to vector<64x16xf32>
    %32 = arith.maximumf %30, %31 : vector<64x16xf32>
    %c0_33 = arith.constant 0 : index
    %c0_34 = arith.constant 0 : index
    %33 = vector.load %arg6[%c0_33, %c0_34] : memref<16x16xf32, #tpu.memory_space<vmem>>, vector<16x16xf32>
    %c0_35 = arith.constant 0 : index
    %c0_36 = arith.constant 0 : index
    %c0_37 = arith.constant 0 : index
    %34 = vector.load %arg2[%c0_35, %c0_36, %c0_37] : memref<7x16x16xf32, #tpu.memory_space<vmem>>, vector<1x16x16xf32>
    %35 = vector.shape_cast %34 : vector<1x16x16xf32> to vector<16x16xf32>
    %cst_38 = arith.constant dense<0.000000e+00> : vector<64x16xf32>
    %36 = tpu.matmul %32, %35, %cst_38 {dimension_numbers = #tpu.dot_dimension_numbers<[1], [0], [0], [1], [0, 0, 1, 1], [], []>} : vector<64x16xf32>, vector<16x16xf32>, vector<64x16xf32> -> vector<64x16xf32>
    %c0_39 = arith.constant 0 : index
    %c0_40 = arith.constant 0 : index
    %c0_41 = arith.constant 0 : index
    %37 = vector.load %arg5[%c0_39, %c0_40, %c0_41] : memref<4x16x64xf32, #tpu.memory_space<vmem>>, vector<1x16x64xf32>
    %38 = vector.shape_cast %37 : vector<1x16x64xf32> to vector<16x64xf32>
    %cst_42 = arith.constant dense<0.000000e+00> : vector<16x16xf32>
    %39 = tpu.matmul %38, %36, %cst_42 {dimension_numbers = #tpu.dot_dimension_numbers<[1], [0], [0], [1], [0, 0, 1, 1], [], []>} : vector<16x64xf32>, vector<64x16xf32>, vector<16x16xf32> -> vector<16x16xf32>
    %40 = arith.addf %33, %39 : vector<16x16xf32>
    %c1_43 = arith.constant 1 : index
    %c0_44 = arith.constant 0 : index
    %c0_45 = arith.constant 0 : index
    %41 = vector.load %arg2[%c1_43, %c0_44, %c0_45] : memref<7x16x16xf32, #tpu.memory_space<vmem>>, vector<1x16x16xf32>
    %42 = vector.shape_cast %41 : vector<1x16x16xf32> to vector<16x16xf32>
    %cst_46 = arith.constant dense<0.000000e+00> : vector<64x16xf32>
    %43 = tpu.matmul %32, %42, %cst_46 {dimension_numbers = #tpu.dot_dimension_numbers<[1], [0], [0], [1], [0, 0, 1, 1], [], []>} : vector<64x16xf32>, vector<16x16xf32>, vector<64x16xf32> -> vector<64x16xf32>
    %c1_47 = arith.constant 1 : index
    %c0_48 = arith.constant 0 : index
    %c0_49 = arith.constant 0 : index
    %44 = vector.load %arg5[%c1_47, %c0_48, %c0_49] : memref<4x16x64xf32, #tpu.memory_space<vmem>>, vector<1x16x64xf32>
    %45 = vector.shape_cast %44 : vector<1x16x64xf32> to vector<16x64xf32>
    %cst_50 = arith.constant dense<0.000000e+00> : vector<16x16xf32>
    %46 = tpu.matmul %45, %43, %cst_50 {dimension_numbers = #tpu.dot_dimension_numbers<[1], [0], [0], [1], [0, 0, 1, 1], [], []>} : vector<16x64xf32>, vector<64x16xf32>, vector<16x16xf32> -> vector<16x16xf32>
    %47 = arith.addf %40, %46 : vector<16x16xf32>
    %c2_51 = arith.constant 2 : index
    %c0_52 = arith.constant 0 : index
    %c0_53 = arith.constant 0 : index
    %48 = vector.load %arg2[%c2_51, %c0_52, %c0_53] : memref<7x16x16xf32, #tpu.memory_space<vmem>>, vector<1x16x16xf32>
    %49 = vector.shape_cast %48 : vector<1x16x16xf32> to vector<16x16xf32>
    %cst_54 = arith.constant dense<0.000000e+00> : vector<64x16xf32>
    %50 = tpu.matmul %32, %49, %cst_54 {dimension_numbers = #tpu.dot_dimension_numbers<[1], [0], [0], [1], [0, 0, 1, 1], [], []>} : vector<64x16xf32>, vector<16x16xf32>, vector<64x16xf32> -> vector<64x16xf32>
    %c2_55 = arith.constant 2 : index
    %c0_56 = arith.constant 0 : index
    %c0_57 = arith.constant 0 : index
    %51 = vector.load %arg5[%c2_55, %c0_56, %c0_57] : memref<4x16x64xf32, #tpu.memory_space<vmem>>, vector<1x16x64xf32>
    %52 = vector.shape_cast %51 : vector<1x16x64xf32> to vector<16x64xf32>
    %cst_58 = arith.constant dense<0.000000e+00> : vector<16x16xf32>
    %53 = tpu.matmul %52, %50, %cst_58 {dimension_numbers = #tpu.dot_dimension_numbers<[1], [0], [0], [1], [0, 0, 1, 1], [], []>} : vector<16x64xf32>, vector<64x16xf32>, vector<16x16xf32> -> vector<16x16xf32>
    %54 = arith.addf %47, %53 : vector<16x16xf32>
    %c3_59 = arith.constant 3 : index
    %c0_60 = arith.constant 0 : index
    %c0_61 = arith.constant 0 : index
    %55 = vector.load %arg2[%c3_59, %c0_60, %c0_61] : memref<7x16x16xf32, #tpu.memory_space<vmem>>, vector<1x16x16xf32>
    %56 = vector.shape_cast %55 : vector<1x16x16xf32> to vector<16x16xf32>
    %cst_62 = arith.constant dense<0.000000e+00> : vector<64x16xf32>
    %57 = tpu.matmul %32, %56, %cst_62 {dimension_numbers = #tpu.dot_dimension_numbers<[1], [0], [0], [1], [0, 0, 1, 1], [], []>} : vector<64x16xf32>, vector<16x16xf32>, vector<64x16xf32> -> vector<64x16xf32>
    %c3_63 = arith.constant 3 : index
    %c0_64 = arith.constant 0 : index
    %c0_65 = arith.constant 0 : index
    %58 = vector.load %arg5[%c3_63, %c0_64, %c0_65] : memref<4x16x64xf32, #tpu.memory_space<vmem>>, vector<1x16x64xf32>
    %59 = vector.shape_cast %58 : vector<1x16x64xf32> to vector<16x64xf32>
    %cst_66 = arith.constant dense<0.000000e+00> : vector<16x16xf32>
    %60 = tpu.matmul %59, %57, %cst_66 {dimension_numbers = #tpu.dot_dimension_numbers<[1], [0], [0], [1], [0, 0, 1, 1], [], []>} : vector<16x64xf32>, vector<64x16xf32>, vector<16x16xf32> -> vector<16x16xf32>
    %61 = arith.addf %54, %60 : vector<16x16xf32>
    %cst_67 = arith.constant 0.000000e+00 : f32
    %62 = vector.broadcast %cst_67 : f32 to vector<16x16xf32>
    %63 = arith.maximumf %61, %62 : vector<16x16xf32>
    %c0_68 = arith.constant 0 : index
    %c0_69 = arith.constant 0 : index
    %64 = vector.load %arg8[%c0_68, %c0_69] : memref<64x16xf32, #tpu.memory_space<vmem>>, vector<64x16xf32>
    %c3_70 = arith.constant 3 : index
    %c0_71 = arith.constant 0 : index
    %c0_72 = arith.constant 0 : index
    %65 = vector.load %arg2[%c3_70, %c0_71, %c0_72] : memref<7x16x16xf32, #tpu.memory_space<vmem>>, vector<1x16x16xf32>
    %66 = vector.shape_cast %65 : vector<1x16x16xf32> to vector<16x16xf32>
    %cst_73 = arith.constant dense<0.000000e+00> : vector<16x16xf32>
    %67 = tpu.matmul %63, %66, %cst_73 {dimension_numbers = #tpu.dot_dimension_numbers<[1], [0], [0], [1], [0, 0, 1, 1], [], []>} : vector<16x16xf32>, vector<16x16xf32>, vector<16x16xf32> -> vector<16x16xf32>
    %c0_74 = arith.constant 0 : index
    %c0_75 = arith.constant 0 : index
    %c0_76 = arith.constant 0 : index
    %68 = vector.load %arg7[%c0_74, %c0_75, %c0_76] : memref<4x64x16xf32, #tpu.memory_space<vmem>>, vector<1x64x16xf32>
    %69 = vector.shape_cast %68 : vector<1x64x16xf32> to vector<64x16xf32>
    %cst_77 = arith.constant dense<0.000000e+00> : vector<64x16xf32>
    %70 = tpu.matmul %69, %67, %cst_77 {dimension_numbers = #tpu.dot_dimension_numbers<[1], [0], [0], [1], [0, 0, 1, 1], [], []>} : vector<64x16xf32>, vector<16x16xf32>, vector<64x16xf32> -> vector<64x16xf32>
    %71 = arith.addf %64, %70 : vector<64x16xf32>
    %c4 = arith.constant 4 : index
    %c0_78 = arith.constant 0 : index
    %c0_79 = arith.constant 0 : index
    %72 = vector.load %arg2[%c4, %c0_78, %c0_79] : memref<7x16x16xf32, #tpu.memory_space<vmem>>, vector<1x16x16xf32>
    %73 = vector.shape_cast %72 : vector<1x16x16xf32> to vector<16x16xf32>
    %cst_80 = arith.constant dense<0.000000e+00> : vector<16x16xf32>
    %74 = tpu.matmul %63, %73, %cst_80 {dimension_numbers = #tpu.dot_dimension_numbers<[1], [0], [0], [1], [0, 0, 1, 1], [], []>} : vector<16x16xf32>, vector<16x16xf32>, vector<16x16xf32> -> vector<16x16xf32>
    %c1_81 = arith.constant 1 : index
    %c0_82 = arith.constant 0 : index
    %c0_83 = arith.constant 0 : index
    %75 = vector.load %arg7[%c1_81, %c0_82, %c0_83] : memref<4x64x16xf32, #tpu.memory_space<vmem>>, vector<1x64x16xf32>
    %76 = vector.shape_cast %75 : vector<1x64x16xf32> to vector<64x16xf32>
    %cst_84 = arith.constant dense<0.000000e+00> : vector<64x16xf32>
    %77 = tpu.matmul %76, %74, %cst_84 {dimension_numbers = #tpu.dot_dimension_numbers<[1], [0], [0], [1], [0, 0, 1, 1], [], []>} : vector<64x16xf32>, vector<16x16xf32>, vector<64x16xf32> -> vector<64x16xf32>
    %78 = arith.addf %71, %77 : vector<64x16xf32>
    %c5 = arith.constant 5 : index
    %c0_85 = arith.constant 0 : index
    %c0_86 = arith.constant 0 : index
    %79 = vector.load %arg2[%c5, %c0_85, %c0_86] : memref<7x16x16xf32, #tpu.memory_space<vmem>>, vector<1x16x16xf32>
    %80 = vector.shape_cast %79 : vector<1x16x16xf32> to vector<16x16xf32>
    %cst_87 = arith.constant dense<0.000000e+00> : vector<16x16xf32>
    %81 = tpu.matmul %63, %80, %cst_87 {dimension_numbers = #tpu.dot_dimension_numbers<[1], [0], [0], [1], [0, 0, 1, 1], [], []>} : vector<16x16xf32>, vector<16x16xf32>, vector<16x16xf32> -> vector<16x16xf32>
    %c2_88 = arith.constant 2 : index
    %c0_89 = arith.constant 0 : index
    %c0_90 = arith.constant 0 : index
    %82 = vector.load %arg7[%c2_88, %c0_89, %c0_90] : memref<4x64x16xf32, #tpu.memory_space<vmem>>, vector<1x64x16xf32>
    %83 = vector.shape_cast %82 : vector<1x64x16xf32> to vector<64x16xf32>
    %cst_91 = arith.constant dense<0.000000e+00> : vector<64x16xf32>
    %84 = tpu.matmul %83, %81, %cst_91 {dimension_numbers = #tpu.dot_dimension_numbers<[1], [0], [0], [1], [0, 0, 1, 1], [], []>} : vector<64x16xf32>, vector<16x16xf32>, vector<64x16xf32> -> vector<64x16xf32>
    %85 = arith.addf %78, %84 : vector<64x16xf32>
    %c6 = arith.constant 6 : index
    %c0_92 = arith.constant 0 : index
    %c0_93 = arith.constant 0 : index
    %86 = vector.load %arg2[%c6, %c0_92, %c0_93] : memref<7x16x16xf32, #tpu.memory_space<vmem>>, vector<1x16x16xf32>
    %87 = vector.shape_cast %86 : vector<1x16x16xf32> to vector<16x16xf32>
    %cst_94 = arith.constant dense<0.000000e+00> : vector<16x16xf32>
    %88 = tpu.matmul %63, %87, %cst_94 {dimension_numbers = #tpu.dot_dimension_numbers<[1], [0], [0], [1], [0, 0, 1, 1], [], []>} : vector<16x16xf32>, vector<16x16xf32>, vector<16x16xf32> -> vector<16x16xf32>
    %c3_95 = arith.constant 3 : index
    %c0_96 = arith.constant 0 : index
    %c0_97 = arith.constant 0 : index
    %89 = vector.load %arg7[%c3_95, %c0_96, %c0_97] : memref<4x64x16xf32, #tpu.memory_space<vmem>>, vector<1x64x16xf32>
    %90 = vector.shape_cast %89 : vector<1x64x16xf32> to vector<64x16xf32>
    %cst_98 = arith.constant dense<0.000000e+00> : vector<64x16xf32>
    %91 = tpu.matmul %90, %88, %cst_98 {dimension_numbers = #tpu.dot_dimension_numbers<[1], [0], [0], [1], [0, 0, 1, 1], [], []>} : vector<64x16xf32>, vector<16x16xf32>, vector<64x16xf32> -> vector<64x16xf32>
    %92 = arith.addf %85, %91 : vector<64x16xf32>
    %cst_99 = arith.constant 0.000000e+00 : f32
    %93 = vector.broadcast %cst_99 : f32 to vector<64x16xf32>
    %94 = arith.maximumf %92, %93 : vector<64x16xf32>
    %c0_100 = arith.constant 0 : index
    %c0_101 = arith.constant 0 : index
    %95 = vector.load %arg10[%c0_100, %c0_101] : memref<48x16xf32, #tpu.memory_space<vmem>>, vector<48x16xf32>
    %c3_102 = arith.constant 3 : index
    %c0_103 = arith.constant 0 : index
    %c0_104 = arith.constant 0 : index
    %96 = vector.load %arg2[%c3_102, %c0_103, %c0_104] : memref<7x16x16xf32, #tpu.memory_space<vmem>>, vector<1x16x16xf32>
    %97 = vector.shape_cast %96 : vector<1x16x16xf32> to vector<16x16xf32>
    %cst_105 = arith.constant dense<0.000000e+00> : vector<64x16xf32>
    %98 = tpu.matmul %94, %97, %cst_105 {dimension_numbers = #tpu.dot_dimension_numbers<[1], [0], [0], [1], [0, 0, 1, 1], [], []>} : vector<64x16xf32>, vector<16x16xf32>, vector<64x16xf32> -> vector<64x16xf32>
    %c0_106 = arith.constant 0 : index
    %c0_107 = arith.constant 0 : index
    %c0_108 = arith.constant 0 : index
    %99 = vector.load %arg9[%c0_106, %c0_107, %c0_108] : memref<4x48x64xf32, #tpu.memory_space<vmem>>, vector<1x48x64xf32>
    %100 = vector.shape_cast %99 : vector<1x48x64xf32> to vector<48x64xf32>
    %cst_109 = arith.constant dense<0.000000e+00> : vector<48x16xf32>
    %101 = tpu.matmul %100, %98, %cst_109 {dimension_numbers = #tpu.dot_dimension_numbers<[1], [0], [0], [1], [0, 0, 1, 1], [], []>} : vector<48x64xf32>, vector<64x16xf32>, vector<48x16xf32> -> vector<48x16xf32>
    %102 = arith.addf %95, %101 : vector<48x16xf32>
    %c4_110 = arith.constant 4 : index
    %c0_111 = arith.constant 0 : index
    %c0_112 = arith.constant 0 : index
    %103 = vector.load %arg2[%c4_110, %c0_111, %c0_112] : memref<7x16x16xf32, #tpu.memory_space<vmem>>, vector<1x16x16xf32>
    %104 = vector.shape_cast %103 : vector<1x16x16xf32> to vector<16x16xf32>
    %cst_113 = arith.constant dense<0.000000e+00> : vector<64x16xf32>
    %105 = tpu.matmul %94, %104, %cst_113 {dimension_numbers = #tpu.dot_dimension_numbers<[1], [0], [0], [1], [0, 0, 1, 1], [], []>} : vector<64x16xf32>, vector<16x16xf32>, vector<64x16xf32> -> vector<64x16xf32>
    %c1_114 = arith.constant 1 : index
    %c0_115 = arith.constant 0 : index
    %c0_116 = arith.constant 0 : index
    %106 = vector.load %arg9[%c1_114, %c0_115, %c0_116] : memref<4x48x64xf32, #tpu.memory_space<vmem>>, vector<1x48x64xf32>
    %107 = vector.shape_cast %106 : vector<1x48x64xf32> to vector<48x64xf32>
    %cst_117 = arith.constant dense<0.000000e+00> : vector<48x16xf32>
    %108 = tpu.matmul %107, %105, %cst_117 {dimension_numbers = #tpu.dot_dimension_numbers<[1], [0], [0], [1], [0, 0, 1, 1], [], []>} : vector<48x64xf32>, vector<64x16xf32>, vector<48x16xf32> -> vector<48x16xf32>
    %109 = arith.addf %102, %108 : vector<48x16xf32>
    %c5_118 = arith.constant 5 : index
    %c0_119 = arith.constant 0 : index
    %c0_120 = arith.constant 0 : index
    %110 = vector.load %arg2[%c5_118, %c0_119, %c0_120] : memref<7x16x16xf32, #tpu.memory_space<vmem>>, vector<1x16x16xf32>
    %111 = vector.shape_cast %110 : vector<1x16x16xf32> to vector<16x16xf32>
    %cst_121 = arith.constant dense<0.000000e+00> : vector<64x16xf32>
    %112 = tpu.matmul %94, %111, %cst_121 {dimension_numbers = #tpu.dot_dimension_numbers<[1], [0], [0], [1], [0, 0, 1, 1], [], []>} : vector<64x16xf32>, vector<16x16xf32>, vector<64x16xf32> -> vector<64x16xf32>
    %c2_122 = arith.constant 2 : index
    %c0_123 = arith.constant 0 : index
    %c0_124 = arith.constant 0 : index
    %113 = vector.load %arg9[%c2_122, %c0_123, %c0_124] : memref<4x48x64xf32, #tpu.memory_space<vmem>>, vector<1x48x64xf32>
    %114 = vector.shape_cast %113 : vector<1x48x64xf32> to vector<48x64xf32>
    %cst_125 = arith.constant dense<0.000000e+00> : vector<48x16xf32>
    %115 = tpu.matmul %114, %112, %cst_125 {dimension_numbers = #tpu.dot_dimension_numbers<[1], [0], [0], [1], [0, 0, 1, 1], [], []>} : vector<48x64xf32>, vector<64x16xf32>, vector<48x16xf32> -> vector<48x16xf32>
    %116 = arith.addf %109, %115 : vector<48x16xf32>
    %c6_126 = arith.constant 6 : index
    %c0_127 = arith.constant 0 : index
    %c0_128 = arith.constant 0 : index
    %117 = vector.load %arg2[%c6_126, %c0_127, %c0_128] : memref<7x16x16xf32, #tpu.memory_space<vmem>>, vector<1x16x16xf32>
    %118 = vector.shape_cast %117 : vector<1x16x16xf32> to vector<16x16xf32>
    %cst_129 = arith.constant dense<0.000000e+00> : vector<64x16xf32>
    %119 = tpu.matmul %94, %118, %cst_129 {dimension_numbers = #tpu.dot_dimension_numbers<[1], [0], [0], [1], [0, 0, 1, 1], [], []>} : vector<64x16xf32>, vector<16x16xf32>, vector<64x16xf32> -> vector<64x16xf32>
    %c3_130 = arith.constant 3 : index
    %c0_131 = arith.constant 0 : index
    %c0_132 = arith.constant 0 : index
    %120 = vector.load %arg9[%c3_130, %c0_131, %c0_132] : memref<4x48x64xf32, #tpu.memory_space<vmem>>, vector<1x48x64xf32>
    %121 = vector.shape_cast %120 : vector<1x48x64xf32> to vector<48x64xf32>
    %cst_133 = arith.constant dense<0.000000e+00> : vector<48x16xf32>
    %122 = tpu.matmul %121, %119, %cst_133 {dimension_numbers = #tpu.dot_dimension_numbers<[1], [0], [0], [1], [0, 0, 1, 1], [], []>} : vector<48x64xf32>, vector<64x16xf32>, vector<48x16xf32> -> vector<48x16xf32>
    %123 = arith.addf %116, %122 : vector<48x16xf32>
    %cst_134 = arith.constant 0.000000e+00 : f32
    %124 = vector.broadcast %cst_134 : f32 to vector<48x16xf32>
    %125 = arith.subf %124, %123 : vector<48x16xf32>
    %126 = math.exp %125 : vector<48x16xf32>
    %cst_135 = arith.constant 1.000000e+00 : f32
    %127 = vector.broadcast %cst_135 : f32 to vector<48x16xf32>
    %128 = arith.addf %127, %126 : vector<48x16xf32>
    %cst_136 = arith.constant 1.000000e+00 : f32
    %129 = vector.broadcast %cst_136 : f32 to vector<48x16xf32>
    %130 = arith.divf %129, %128 : vector<48x16xf32>
    %c0_137 = arith.constant 0 : index
    %c0_138 = arith.constant 0 : index
    %c0_139 = arith.constant 0 : index
    %131 = vector.load %arg11[%c0_137, %c0_138, %c0_139] : memref<1x48x16xf32, #tpu.memory_space<vmem>>, vector<1x48x16xf32>
    %132 = vector.shape_cast %131 : vector<1x48x16xf32> to vector<48x16xf32>
    %133 = vector.shape_cast %130 : vector<48x16xf32> to vector<1x48x16xf32>
    tpu.vector_store %arg11[%c0_137, %c0_138, %c0_139], %133 {strides = array<i32>} : memref<1x48x16xf32, #tpu.memory_space<vmem>>, vector<1x48x16xf32>,
    return
  }
  func.func @transform_0(%arg0: i32) -> (i32, i32, i32) {
    %c0_i32 = arith.constant 0 : i32
    %c0_i32_0 = arith.constant 0 : i32
    %c0_i32_1 = arith.constant 0 : i32
    return %arg0, %c0_i32, %c0_i32_0 : i32, i32, i32
  }
  func.func @transform_1(%arg0: i32) -> (i32, i32, i32) {
    %c0_i32 = arith.constant 0 : i32
    %c0_i32_0 = arith.constant 0 : i32
    %c0_i32_1 = arith.constant 0 : i32
    %c0_i32_2 = arith.constant 0 : i32
    return %c0_i32, %c0_i32_0, %c0_i32_1 : i32, i32, i32
  }
  func.func @transform_2(%arg0: i32) -> (i32, i32, i32) {
    %c0_i32 = arith.constant 0 : i32
    %c0_i32_0 = arith.constant 0 : i32
    %c0_i32_1 = arith.constant 0 : i32
    %c0_i32_2 = arith.constant 0 : i32
    return %c0_i32, %c0_i32_0, %c0_i32_1 : i32, i32, i32
  }
  func.func @transform_3(%arg0: i32) -> (i32, i32) {
    %c0_i32 = arith.constant 0 : i32
    %c0_i32_0 = arith.constant 0 : i32
    %c0_i32_1 = arith.constant 0 : i32
    return %c0_i32, %c0_i32_0 : i32, i32
  }
  func.func @transform_4(%arg0: i32) -> (i32, i32, i32) {
    %c0_i32 = arith.constant 0 : i32
    %c0_i32_0 = arith.constant 0 : i32
    %c0_i32_1 = arith.constant 0 : i32
    %c0_i32_2 = arith.constant 0 : i32
    return %c0_i32, %c0_i32_0, %c0_i32_1 : i32, i32, i32
  }
  func.func @transform_5(%arg0: i32) -> (i32, i32) {
    %c0_i32 = arith.constant 0 : i32
    %c0_i32_0 = arith.constant 0 : i32
    %c0_i32_1 = arith.constant 0 : i32
    return %c0_i32, %c0_i32_0 : i32, i32
  }
  func.func @transform_6(%arg0: i32) -> (i32, i32, i32) {
    %c0_i32 = arith.constant 0 : i32
    %c0_i32_0 = arith.constant 0 : i32
    %c0_i32_1 = arith.constant 0 : i32
    %c0_i32_2 = arith.constant 0 : i32
    return %c0_i32, %c0_i32_0, %c0_i32_1 : i32, i32, i32
  }
  func.func @transform_7(%arg0: i32) -> (i32, i32) {
    %c0_i32 = arith.constant 0 : i32
    %c0_i32_0 = arith.constant 0 : i32
    %c0_i32_1 = arith.constant 0 : i32
    return %c0_i32, %c0_i32_0 : i32, i32
  }
  func.func @transform_8(%arg0: i32) -> (i32, i32, i32) {
    %c0_i32 = arith.constant 0 : i32
    %c0_i32_0 = arith.constant 0 : i32
    %c0_i32_1 = arith.constant 0 : i32
    %c0_i32_2 = arith.constant 0 : i32
    return %c0_i32, %c0_i32_0, %c0_i32_1 : i32, i32, i32
  }
  func.func @transform_9(%arg0: i32) -> (i32, i32) {
    %c0_i32 = arith.constant 0 : i32
    %c0_i32_0 = arith.constant 0 : i32
    %c0_i32_1 = arith.constant 0 : i32
    return %c0_i32, %c0_i32_0 : i32, i32
  }
  func.func @transform_10(%arg0: i32) -> (i32, i32, i32) {
    %c0_i32 = arith.constant 0 : i32
    %c0_i32_0 = arith.constant 0 : i32
    %c0_i32_1 = arith.constant 0 : i32
    return %arg0, %c0_i32, %c0_i32_0 : i32, i32, i32
  }
}

</mosaic_0001>

<bundles_post_ra>
// kernel: forward.1
= control target key start
LH: loop header
LB: loop body
LE: loop exit
PB: predicated region body
PF: predicated region fallthrough
CT: control target
= control target key end

     0   :  { %s5729_s13 = smov 0   ;;  %s6533_s0 = inlined_call_operand.vmem [shape: f32[2,48,16], index: 0, kind: input, shape index: {}]   ;;  %s6534_s1 = inlined_call_operand.vmem [shape: f32[7,16,16], index: 1, kind: input, shape index: {}]   ;;  %s6535_s2 = inlined_call_operand.vmem [shape: f32[4,64,48], index: 2, kind: input, shape index: {}]   ;;  %s6536_s3 = inlined_call_operand.vmem [shape: f32[64,16], index: 3, kind: input, shape index: {}]   ;;  %s6537_s4 = inlined_call_operand.vmem [shape: f32[4,16,64], index: 4, kind: input, shape index: {}]   ;;  %s6538_s5 = inlined_call_operand.vmem [shape: f32[16,16], index: 5, kind: input, shape index: {}]   ;;  %s6539_s6 = inlined_call_operand.vmem [shape: f32[4,64,16], index: 6, kind: input, shape index: {}]   ;;  %s6540_s7 = inlined_call_operand.vmem [shape: f32[64,16], index: 7, kind: input, shape index: {}]   ;;  %s6541_s8 = inlined_call_operand.vmem [shape: f32[4,48,64], index: 8, kind: input, shape index: {}]   ;;  %s6542_s9 = inlined_call_operand.vmem [shape: f32[48,16], index: 9, kind: input, shape index: {}]   ;;  %s6543_s10 = inlined_call_operand.vmem [shape: f32[2,48,16], index: 10, kind: output, shape index: {}]  }
   0x1 LB: > { %s4132_s14 = sadd.s32 4294967295, %s5672_s13   ;;  %p4136_p0 = scmp.ge.s32.totalorder %s5672_s13, 1  ;;  %s5672_s13 = sphi %s5729_s13, %s20_s13  }
   0x2   : > { %p312_p1 = scmp.lt.s32.totalorder %s5672_s13, 3 }
   0x4   : > { %p313_p2 = pnand %p4136_p0, %p312_p1 }
   0x5   : > { %v374_v0 = vld [vmem:[%s6534_s1] sm:$0xff] (!%p313_p2)  ;;  %v375_v1 = vld [vmem:[%s6534_s1 + $0x8] sm:$0xff] (!%p313_p2)  ;;  %p350_p3 = scmp.lt.s32.totalorder (!%p313_p2), %s4132_s14, 1  ;;  %v4153_v2 = vld [vmem:[%s6534_s1 + $0x10] sm:$0xff] (!%p313_p2)  ;;  %vm376_vm0 = vcmask (!%p313_p2), 130048   ;;  %vm498_vm1 = vcmask (!%p313_p2), 392192  }
   0x6   : > { %316 = sbr.rel (%p313_p2) target bundleno = 2471 (0x9a7), region = 60  ;;  %v5281_v3 = vpack.c.bf16 (!%p313_p2), %v375_v1, %v374_v0  ;;  %v4154_v4 = vld [vmem:[%s6534_s1 + $0x18] sm:$0xff] (!%p313_p2)  ;;  %v4177_v5 = vld [vmem:[%s6534_s1 + $0x20] sm:$0xff] (!%p313_p2)  ;;  %v4178_v6 = vld [vmem:[%s6534_s1 + $0x28] sm:$0xff] (!%p313_p2)  ;;  %vm1509_vm2 = vcmask (!%p313_p2), 523264  }
   0x7   : > { %v5757_v7 = vpack.c.bf16 (!%p313_p2), %v4154_v4, %v4153_v2  ;;  %v5759_v8 = vpack.c.bf16 (!%p313_p2), %v4178_v6, %v4177_v5  ;;  %v4201_v9 = vld [vmem:[%s6534_s1 + $0x30] sm:$0xff] (!%p313_p2)  ;;  %v4202_v10 = vld [vmem:[%s6534_s1 + $0x38] sm:$0xff] (!%p313_p2)  ;;  %v490_v18 = vld [vmem:[%s6535_s2] sm:$0xff] (!%p313_p2) }
   0x8   : > { %5282 = vmatprep.subr.bf16.mxu1 (!%p313_p2), %v5281_v3  ;;  %v5778_v14 = vpack.c.bf16 (!%p313_p2), %v4202_v10, %v4201_v9  ;;  %v491_v38 = vld [vmem:[%s6535_s2 + $0x8] sm:$0xff] (!%p313_p2)  ;;  %v492_v40 = vld [vmem:[%s6535_s2 + $0x10] sm:$0xff] (!%p313_p2)  ;;  %v493_v43 = vld [vmem:[%s6535_s2 + $0x18] sm:$0xff] (!%p313_p2) }
   0x9   : > { %5284 = vmatpush3.bf16.msra.mxu1 (!%p313_p2), %v5281_v3  ;;  %5298 = vmatprep.subr.bf16.mxu0 (!%p313_p2), %v5757_v7  ;;  %v494_v45 = vld [vmem:[%s6535_s2 + $0x20] sm:$0xff] (!%p313_p2)  ;;  %v495_v48 = vld [vmem:[%s6535_s2 + $0x28] sm:$0xff] (!%p313_p2)  ;;  %v496_v50 = vld [vmem:[%s6535_s2 + $0x30] sm:$0xff] (!%p313_p2) }
   0xa   : > { %5300 = vmatpush3.bf16.msra.mxu0 (!%p313_p2), %v5757_v7  ;;  %v497_v53 = vld [vmem:[%s6535_s2 + $0x38] sm:$0xff] (!%p313_p2)  ;;  %v4161_v55 = vld [vmem:[%s6535_s2 + $0x40] sm:$0xff] (!%p313_p2)  ;;  %v4162_v58 = vld [vmem:[%s6535_s2 + $0x48] sm:$0xff] (!%p313_p2) }
   0xb   : > { %5314 = vmatprep.subr.bf16.mxu0 (!%p313_p2), %v5759_v8  ;;  %v4163_v60 = vld [vmem:[%s6535_s2 + $0x50] sm:$0xff] (!%p313_p2)  ;;  %v4164_v63 = vld [vmem:[%s6535_s2 + $0x58] sm:$0xff] (!%p313_p2)  ;;  %v4165_v1 = vld [vmem:[%s6535_s2 + $0x60] sm:$0xff] (!%p313_p2) }
   0xc   : > { %v4167_v4 = vld [vmem:[%s6535_s2 + $0x70] sm:$0xff] (!%p313_p2)  ;;  %v4168_v5 = vld [vmem:[%s6535_s2 + $0x78] sm:$0xff] (!%p313_p2)  ;;  %v4185_v6 = vld [vmem:[%s6535_s2 + $0x80] sm:$0xff] (!%p313_p2) }
   0xd   : > { %s6545_s14 = smov (!%p350_p3, %s4132_s14), 1  ;;  %v4186_v9 = vld [vmem:[%s6535_s2 + $0x88] sm:$0xff]  ;;  %v4187_v10 = vld [vmem:[%s6535_s2 + $0x90] sm:$0xff] }
   0xe   : > { %s5633_s27 = smul.u32 48, %s6545_s14 }
  0x10   : > { %s354_s16 = scalar_lea.vmem %s6533_s0, %s5633_s27 }
  0x11   : > { %v360_v11 = vld [vmem:[%s354_s16] sm:$0xff]  ;;  %v361_v12 = vld [vmem:[%s354_s16 + $0x8] sm:$0xff]  ;;  %v362_v13 = vld [vmem:[%s354_s16 + $0x10] sm:$0xff] }
  0x12   : > { %4741 = vmatprep.mubr.msk.f32.mxu1 %vm376_vm0, %v360_v11  ;;  %4778 = vmatprep.mubr.msk.f32.mxu0 %vm376_vm0, %v360_v11  ;;  %v363_v15 = vld [vmem:[%s354_s16 + $0x18] sm:$0xff]  ;;  %v364_v16 = vld [vmem:[%s354_s16 + $0x20] sm:$0xff]  ;;  %v365_v17 = vld [vmem:[%s354_s16 + $0x28] sm:$0xff]  ;;  %s359_s16 = scalar_lea.vmem %s6543_s10, %s5633_s27 }
  0x13   : > { %4742 = vmatmul.mubr.msk.f32.vlgmr.msra.gmra.mrb[0].mxu1 %vm376_vm0, %v361_v12  ;;  %4779 = vmatmul.mubr.msk.f32.vlgmr.msra.gmra.mrb[0].mxu0 %vm376_vm0, %v361_v12 }
  0x14   : > { %4744 = vmatprep.mubr.msk.f32.mxu1 %vm376_vm0, %v362_v13  ;;  %4781 = vmatprep.mubr.msk.f32.mxu0 %vm376_vm0, %v362_v13 }
  0x15   : > { %5316 = vmatpush3.bf16.msra.mxu0 %v5759_v8 }
  0x16   : > { %5330 = vmatprep.subr.bf16.mxu0 %v5778_v14 }
  0x17   : > { %4745 = vmatmul.mubr.msk.f32.gmra.mrb[2].mxu1 %vm376_vm0, %v363_v15  ;;  %4782 = vmatmul.mubr.msk.f32.gmra.mrb[2].mxu0 %vm376_vm0, %v363_v15 }
  0x18   : > { %4747 = vmatprep.mubr.msk.f32.mxu1 %vm376_vm0, %v364_v16  ;;  %4784 = vmatprep.mubr.msk.f32.mxu0 %vm376_vm0, %v364_v16 }
  0x1b   : > { %4748 = vmatmul.mubr.msk.f32.gmra.mrb[4].mxu1 %vm376_vm0, %v365_v17  ;;  %4785 = vmatmul.mubr.msk.f32.gmra.mrb[4].mxu0 %vm376_vm0, %v365_v17 }
  0x1c   : > { %4815 = vmatprep.mubr.msk.f32.mxu0 %vm376_vm0, %v360_v11  ;;  %4762 = vmatprep.mubr.msk.f32.mxu1 %vm498_vm1, %v490_v18  ;;  %v4210_v18 = vld [vmem:[%s6535_s2 + $0xc8] sm:$0xff] }
  0x1f   : > { %4816 = vmatmul.mubr.msk.f32.vlgmr.msra.gmra.mrb[6].mxu0 %vm376_vm0, %v361_v12 }
  0x20   : > { %4818 = vmatprep.mubr.msk.f32.mxu0 %vm376_vm0, %v362_v13  ;;  %5332 = vmatpush3.bf16.msra.mxu0 %v5778_v14 }
  0x21   : > { %5346 = vmatprep.subr.bf16.mxu0 %v5281_v3 }
  0x23   : > { %4819 = vmatmul.mubr.msk.f32.gmra.mrb[8].mxu0 %vm376_vm0, %v363_v15 }
  0x24   : > { %4821 = vmatprep.mubr.msk.f32.mxu0 %vm376_vm0, %v364_v16 }
  0x27   : > { %4822 = vmatmul.mubr.msk.f32.gmra.mrb[10].mxu0 %vm376_vm0, %v365_v17 }
  0x28   : > { %4852 = vmatprep.mubr.msk.f32.mxu0 %vm376_vm0, %v360_v11  ;;  %v4188_v11 = vld [vmem:[%s6535_s2 + $0x98] sm:$0xff] }
  0x2b   : > { %4853 = vmatmul.mubr.msk.f32.vlgmr.msra.gmra.mrb[12].mxu0 %vm376_vm0, %v361_v12  ;;  %v4189_v12 = vld [vmem:[%s6535_s2 + $0xa0] sm:$0xff] }
  0x2c   : > { %4855 = vmatprep.mubr.msk.f32.mxu0 %vm376_vm0, %v362_v13  ;;  %5348 = vmatpush3.bf16.msra.mxu0 %v5281_v3  ;;  %v4166_v3 = vld [vmem:[%s6535_s2 + $0x68] sm:$0xff] }
  0x2d   : > { %v4190_v13 = vld [vmem:[%s6535_s2 + $0xa8] sm:$0xff] }
  0x2f   : > { %4856 = vmatmul.mubr.msk.f32.gmra.mrb[14].mxu0 %vm376_vm0, %v363_v15  ;;  %v4191_v15 = vld [vmem:[%s6535_s2 + $0xb0] sm:$0xff] }
  0x30   : > { %4858 = vmatprep.mubr.msk.f32.mxu0 %vm376_vm0, %v364_v16  ;;  %v4192_v16 = vld [vmem:[%s6535_s2 + $0xb8] sm:$0xff] }
  0x33   : > { %4859 = vmatmul.mubr.msk.f32.gmra.mrb[16].mxu0 %vm376_vm0, %v365_v17  ;;  %v4209_v17 = vld [vmem:[%s6535_s2 + $0xc0] sm:$0xff] }
  0xe6   : > { %v4743_v19 = vpop.f32.mrb[0].mxu1  ;;  %v4780_v20 = vpop.f32.mrb[0].mxu0 }
  0xe7   : > { %v461_v21 = vpop.f32.mrb[1].mxu1  ;;  %v705_v22 = vpop.f32.mrb[1].mxu0 }
  0xe8   : > { %v5285_v23 = vpack.c.bf16 %v4743_v19, %v461_v21  ;;  %v5301_v24 = vpack.c.bf16 %v4780_v20, %v705_v22  ;;  %v4211_v19 = vld [vmem:[%s6535_s2 + $0xd0] sm:$0xff]  ;;  %v4212_v20 = vld [vmem:[%s6535_s2 + $0xd8] sm:$0xff]  ;;  %v4213_v21 = vld [vmem:[%s6535_s2 + $0xe0] sm:$0xff] }
  0xe9   : > { %v4214_v22 = vld [vmem:[%s6535_s2 + $0xe8] sm:$0xff] }
  0xea   : > { %v4746_v25 = vpop.f32.mrb[2].mxu1  ;;  %5286 = vmatprep.subr.bf16.mxu1 %v5285_v23  ;;  %v4783_v26 = vpop.f32.mrb[2].mxu0 }
  0xeb   : > { %v471_v27 = vpop.f32.mrb[3].mxu1  ;;  %5288 = vmatpush3.bf16.msra.mxu1 %v5285_v23  ;;  %v715_v28 = vpop.f32.mrb[3].mxu0  ;;  %v4215_v23 = vld [vmem:[%s6535_s2 + $0xf0] sm:$0xff] }
  0xec   : > { %v5289_v29 = vpack.c.bf16 %v4746_v25, %v471_v27  ;;  %v5305_v30 = vpack.c.bf16 %v4783_v26, %v715_v28  ;;  %v366_v25 = vld [vmem:[%s6536_s3] sm:$0xff] }
  0xee   : > { %v4749_v31 = vpop.f32.mrb[4].mxu1  ;;  %5290 = vmatprep.subr.bf16.mxu1 %v5289_v29  ;;  %v4786_v32 = vpop.f32.mrb[4].mxu0 }
  0xef   : > { %v481_v33 = vpop.f32.mrb[5].mxu1  ;;  %5292 = vmatpush3.bf16.msra.mxu1 %v5289_v29  ;;  %v725_v34 = vpop.f32.mrb[5].mxu0 }
  0xf0   : > { %v5293_v35 = vpack.c.bf16 %v4749_v31, %v481_v33  ;;  %v5309_v36 = vpack.c.bf16 %v4786_v32, %v725_v34  ;;  %v368_v31 = vld [vmem:[%s6536_s3 + $0x10] sm:$0xff] }
  0xf2   : > { %5294 = vmatprep.subr.bf16.mxu1 %v5293_v35  ;;  %v4817_v37 = vpop.f32.mrb[6].mxu0 }
  0xf3   : > { %5296 = vmatpush3.bf16.msra.mxu1 %v5293_v35  ;;  %v949_v39 = vpop.f32.mrb[7].mxu0 }
  0xf4   : > { %5302 = vmatprep.subr.bf16.mxu1 %v5301_v24  ;;  %v5317_v41 = vpack.c.bf16 %v4817_v37, %v949_v39  ;;  %v370_v39 = vld [vmem:[%s6536_s3 + $0x20] sm:$0xff] }
  0xf6   : > { %4763 = vmatmul.mubr.msk.f32.vlgmr.msra.gmra.mrb[6].mxu1 %vm498_vm1, %v491_v38  ;;  %v4820_v42 = vpop.f32.mrb[8].mxu0  ;;  %v371_v38 = vld [vmem:[%s6536_s3 + $0x28] sm:$0xff] }
  0xf7   : > { %5304 = vmatpush3.bf16.msra.mxu1 %v5301_v24  ;;  %4765 = vmatprep.mubr.msk.f32.mxu1 %vm498_vm1, %v492_v40  ;;  %v959_v44 = vpop.f32.mrb[9].mxu0  ;;  %v367_v24 = vld [vmem:[%s6536_s3 + $0x8] sm:$0xff] }
  0xf8   : > { %5306 = vmatprep.subr.bf16.mxu1 %v5305_v30  ;;  %v5321_v46 = vpack.c.bf16 %v4820_v42, %v959_v44 }
  0xfa   : > { %4766 = vmatmul.mubr.msk.f32.gmra.mrb[8].mxu1 %vm498_vm1, %v493_v43  ;;  %v4823_v47 = vpop.f32.mrb[10].mxu0 }
  0xfb   : > { %5308 = vmatpush3.bf16.msra.mxu1 %v5305_v30  ;;  %4768 = vmatprep.mubr.msk.f32.mxu1 %vm498_vm1, %v494_v45  ;;  %v969_v49 = vpop.f32.mrb[11].mxu0  ;;  %v369_v30 = vld [vmem:[%s6536_s3 + $0x18] sm:$0xff] }
  0xfc   : > { %5310 = vmatprep.subr.bf16.mxu1 %v5309_v36  ;;  %v5325_v51 = vpack.c.bf16 %v4823_v47, %v969_v49  ;;  %v372_v47 = vld [vmem:[%s6536_s3 + $0x30] sm:$0xff] }
  0xfe   : > { %4769 = vmatmul.mubr.msk.f32.gmra.mrb[10].mxu1 %vm498_vm1, %v495_v48  ;;  %v4854_v52 = vpop.f32.mrb[12].mxu0 }
  0xff   : > { %5312 = vmatpush3.bf16.msra.mxu1 %v5309_v36  ;;  %4771 = vmatprep.mubr.msk.f32.mxu1 %vm498_vm1, %v496_v50  ;;  %v1193_v54 = vpop.f32.mrb[13].mxu0 }
 0x100   : > { %5318 = vmatprep.subr.bf16.mxu1 %v5317_v41  ;;  %v5333_v56 = vpack.c.bf16 %v4854_v52, %v1193_v54 }
 0x102   : > { %4772 = vmatmul.mubr.msk.f32.gmra.mrb[12].mxu1 %vm498_vm1, %v497_v53  ;;  %v4857_v57 = vpop.f32.mrb[14].mxu0 }
 0x103   : > { %4799 = vmatprep.mubr.msk.f32.mxu1 %vm498_vm1, %v4161_v55  ;;  %v1203_v59 = vpop.f32.mrb[15].mxu0 }
 0x104   : > { %v5337_v61 = vpack.c.bf16 %v4857_v57, %v1203_v59 }
 0x106   : > { %4800 = vmatmul.mubr.msk.f32.vlgmr.msra.gmra.mrb[6].mxu1 %vm498_vm1, %v4162_v58  ;;  %v4860_v62 = vpop.f32.mrb[16].mxu0 }
 0x107   : > { %5320 = vmatpush3.bf16.msra.mxu1 %v5317_v41  ;;  %4802 = vmatprep.mubr.msk.f32.mxu1 %vm498_vm1, %v4163_v60  ;;  %v1213_v0 = vpop.f32.mrb[17].mxu0 }
 0x108   : > { %5322 = vmatprep.subr.bf16.mxu1 %v5321_v46  ;;  %v5341_v2 = vpack.c.bf16 %v4860_v62, %v1213_v0 }
 0x10a   : > { %4803 = vmatmul.mubr.msk.f32.gmra.mrb[8].mxu1 %vm498_vm1, %v4164_v63 }
 0x10b   : > { %5324 = vmatpush3.bf16.msra.mxu1 %v5321_v46  ;;  %4805 = vmatprep.mubr.msk.f32.mxu1 %vm498_vm1, %v4165_v1  ;;  %v373_v46 = vld [vmem:[%s6536_s3 + $0x38] sm:$0xff] }
 0x10c   : > { %5326 = vmatprep.subr.bf16.mxu1 %v5325_v51 }
 0x10e   : > { %4806 = vmatmul.mubr.msk.f32.gmra.mrb[10].mxu1 %vm498_vm1, %v4166_v3 }
 0x10f   : > { %5328 = vmatpush3.bf16.msra.mxu1 %v5325_v51  ;;  %4808 = vmatprep.mubr.msk.f32.mxu1 %vm498_vm1, %v4167_v4 }
 0x110   : > { %5334 = vmatprep.subr.bf16.mxu1 %v5333_v56 }
 0x112   : > { %4809 = vmatmul.mubr.msk.f32.gmra.mrb[12].mxu1 %vm498_vm1, %v4168_v5 }
 0x113   : > { %4836 = vmatprep.mubr.msk.f32.mxu1 %vm498_vm1, %v4185_v6 }
 0x116   : > { %4837 = vmatmul.mubr.msk.f32.vlgmr.msra.gmra.mrb[6].mxu1 %vm498_vm1, %v4186_v9 }
 0x117   : > { %5336 = vmatpush3.bf16.msra.mxu1 %v5333_v56  ;;  %4839 = vmatprep.mubr.msk.f32.mxu1 %vm498_vm1, %v4187_v10  ;;  %v1507_v56 = vld [vmem:[%s6537_s4] sm:$0xff] }
 0x118   : > { %5338 = vmatprep.subr.bf16.mxu1 %v5337_v61 }
 0x11a   : > { %4840 = vmatmul.mubr.msk.f32.gmra.mrb[8].mxu1 %vm498_vm1, %v4188_v11 }
 0x11b   : > { %5340 = vmatpush3.bf16.msra.mxu1 %v5337_v61  ;;  %4842 = vmatprep.mubr.msk.f32.mxu1 %vm498_vm1, %v4189_v12 }
 0x11c   : > { %5342 = vmatprep.subr.bf16.mxu1 %v5341_v2 }
 0x11e   : > { %4843 = vmatmul.mubr.msk.f32.gmra.mrb[10].mxu1 %vm498_vm1, %v4190_v13 }
 0x11f   : > { %5344 = vmatpush3.bf16.msra.mxu1 %v5341_v2  ;;  %4845 = vmatprep.mubr.msk.f32.mxu1 %vm498_vm1, %v4191_v15 }
 0x120   : > { %5386 = vmatprep.subr.bf16.mxu1 %v5759_v8 }
 0x122   : > { %4846 = vmatmul.mubr.msk.f32.gmra.mrb[12].mxu1 %vm498_vm1, %v4192_v16 }
 0x123   : > { %4873 = vmatprep.mubr.msk.f32.mxu1 %vm498_vm1, %v4209_v17 }
 0x126   : > { %4874 = vmatmul.mubr.msk.f32.vlgmr.msra.gmra.mrb[6].mxu1 %vm498_vm1, %v4210_v18 }
 0x127   : > { %4876 = vmatprep.mubr.msk.f32.mxu1 %vm498_vm1, %v4211_v19  ;;  %5388 = vmatpush3.bf16.msra.mxu1 %v5759_v8  ;;  %v4216_v8 = vld [vmem:[%s6535_s2 + $0xf8] sm:$0xff] }
 0x128   : > { %5406 = vmatprep.subr.bf16.mxu1 %v5778_v14 }
 0x12a   : > { %4877 = vmatmul.mubr.msk.f32.gmra.mrb[8].mxu1 %vm498_vm1, %v4212_v20 }
 0x12b   : > { %4879 = vmatprep.mubr.msk.f32.mxu1 %vm498_vm1, %v4213_v21 }
 0x12e   : > { %4880 = vmatmul.mubr.msk.f32.gmra.mrb[10].mxu1 %vm498_vm1, %v4214_v22  ;;  %v1508_v22 = vld [vmem:[%s6537_s4 + $0x8] sm:$0xff] }
 0x12f   : > { %4882 = vmatprep.mubr.msk.f32.mxu1 %vm498_vm1, %v4215_v23 }
 0x132   : > { %4883 = vmatmul.mubr.msk.f32.gmra.mrb[12].mxu1 %vm498_vm1, %v4216_v8 }
 0x1f9   : > { %v4875_v26 = vpop.f32.mrb[6].mxu1 }
 0x1fa   : > { %v5537_v27 = vadd.f32 %v4875_v26, %v367_v24  ;;  %v1321_v28 = vpop.f32.mrb[7].mxu1 }
 0x1fb   : > { %v5538_v29 = vadd.f32 %v1321_v28, %v366_v25 }
 0x1fc   : > { %v5950_v34 = vmax.f32 %v5537_v27, 0.0 }
 0x1fd   : > { %v5948_v32 = vmax.f32 %v5538_v29, 0.0  ;;  %v4878_v33 = vpop.f32.mrb[8].mxu1 }
 0x1fe   : > { %v5539_v35 = vadd.f32 %v4878_v33, %v369_v30  ;;  %v1331_v36 = vpop.f32.mrb[9].mxu1 }
 0x1ff   : > { %v5540_v37 = vadd.f32 %v1331_v36, %v368_v31  ;;  %4889 = vmatprep.mubr.msk.f32.mxu0 %vm376_vm0, %v5948_v32  ;;  %4959 = vmatprep.mubr.msk.f32.mxu1 %vm376_vm0, %v5948_v32  ;;  %v4243_v31 = vld [vmem:[%s6537_s4 + $0x10] sm:$0xff] }
 0x200   : > { %4890 = vmatmul.mubr.msk.f32.vlgmr.msra.gmra.mrb[18].mxu0 %vm376_vm0, %v5950_v34  ;;  %4960 = vmatmul.mubr.msk.f32.vlgmr.msra.gmra.mrb[14].mxu1 %vm376_vm0, %v5950_v34  ;;  %v5969_v42 = vmax.f32 %v5539_v35, 0.0 }
 0x201   : > { %v5966_v40 = vmax.f32 %v5540_v37, 0.0  ;;  %v4881_v41 = vpop.f32.mrb[10].mxu1  ;;  %5408 = vmatpush3.bf16.msra.mxu1 %v5778_v14 }
 0x202   : > { %v5541_v43 = vadd.f32 %v4881_v41, %v371_v38  ;;  %v1341_v44 = vpop.f32.mrb[11].mxu1  ;;  %5426 = vmatprep.subr.bf16.mxu1 %v5778_v14 }
 0x203   : > { %v5542_v45 = vadd.f32 %v1341_v44, %v370_v39  ;;  %4892 = vmatprep.mubr.msk.f32.mxu0 %vm376_vm0, %v5966_v40  ;;  %4962 = vmatprep.mubr.msk.f32.mxu1 %vm376_vm0, %v5966_v40  ;;  %v4244_v44 = vld [vmem:[%s6537_s4 + $0x18] sm:$0xff] }
 0x204   : > { %4893 = vmatmul.mubr.msk.f32.gmra.mrb[20].mxu0 %vm376_vm0, %v5969_v42  ;;  %4963 = vmatmul.mubr.msk.f32.gmra.mrb[16].mxu1 %vm376_vm0, %v5969_v42  ;;  %v5988_v50 = vmax.f32 %v5541_v43, 0.0 }
 0x205   : > { %v5986_v48 = vmax.f32 %v5542_v45, 0.0  ;;  %v4884_v49 = vpop.f32.mrb[12].mxu1  ;;  %v4255_v45 = vld [vmem:[%s6537_s4 + $0x20] sm:$0xff] }
 0x206   : > { %v5543_v51 = vadd.f32 %v4884_v49, %v373_v46  ;;  %v1351_v52 = vpop.f32.mrb[13].mxu1  ;;  %v4256_v46 = vld [vmem:[%s6537_s4 + $0x28] sm:$0xff]  ;;  %v4281_v49 = vld [vmem:[%s6534_s1 + $0x40] sm:$0xff] }
 0x207   : > { %v5544_v53 = vadd.f32 %v1351_v52, %v372_v47  ;;  %4895 = vmatprep.mubr.msk.f32.mxu0 %vm376_vm0, %v5986_v48  ;;  %4965 = vmatprep.mubr.msk.f32.mxu1 %vm376_vm0, %v5986_v48  ;;  %v4267_v47 = vld [vmem:[%s6537_s4 + $0x30] sm:$0xff] }
 0x208   : > { %4896 = vmatmul.mubr.msk.f32.gmra.mrb[22].mxu0 %vm376_vm0, %v5988_v50  ;;  %4966 = vmatmul.mubr.msk.f32.gmra.mrb[18].mxu1 %vm376_vm0, %v5988_v50  ;;  %v6000_v55 = vmax.f32 %v5543_v51, 0.0  ;;  %v4301_v52 = vld [vmem:[%s6534_s1 + $0x50] sm:$0xff] }
 0x209   : > { %v5998_v54 = vmax.f32 %v5544_v53, 0.0  ;;  %v4302_v53 = vld [vmem:[%s6534_s1 + $0x58] sm:$0xff] }
 0x20b   : > { %4898 = vmatprep.mubr.msk.f32.mxu0 %vm376_vm0, %v5998_v54  ;;  %4968 = vmatprep.mubr.msk.f32.mxu1 %vm376_vm0, %v5998_v54 }
 0x20c   : > { %4899 = vmatmul.mubr.msk.f32.gmra.mrb[24].mxu0 %vm376_vm0, %v6000_v55  ;;  %4969 = vmatmul.mubr.msk.f32.gmra.mrb[20].mxu1 %vm376_vm0, %v6000_v55 }
 0x20d   : > { %4994 = vmatprep.mubr.msk.f32.mxu1 %vm376_vm0, %v5948_v32  ;;  %4917 = vmatprep.mubr.msk.f32.mxu0 %vm1509_vm2, %v1507_v56  ;;  %v1376_v56 = vld [vmem:[%s6538_s5] sm:$0xff] }
 0x210   : > { %4995 = vmatmul.mubr.msk.f32.vlgmr.msra.gmra.mrb[22].mxu1 %vm376_vm0, %v5950_v34 }
 0x211   : > { %4997 = vmatprep.mubr.msk.f32.mxu1 %vm376_vm0, %v5966_v40  ;;  %5428 = vmatpush3.bf16.msra.mxu1 %v5778_v14 }
 0x214   : > { %4998 = vmatmul.mubr.msk.f32.gmra.mrb[24].mxu1 %vm376_vm0, %v5969_v42 }
 0x215   : > { %5000 = vmatprep.mubr.msk.f32.mxu1 %vm376_vm0, %v5986_v48 }
 0x218   : > { %5001 = vmatmul.mubr.msk.f32.gmra.mrb[26].mxu1 %vm376_vm0, %v5988_v50 }
 0x219   : > { %5003 = vmatprep.mubr.msk.f32.mxu1 %vm376_vm0, %v5998_v54 }
 0x21c   : > { %5004 = vmatmul.mubr.msk.f32.gmra.mrb[28].mxu1 %vm376_vm0, %v6000_v55 }
 0x2d3   : > { %v4891_v57 = vpop.f32.mrb[18].mxu0  ;;  %v4961_v58 = vpop.f32.mrb[14].mxu1 }
 0x2d4   : > { %v1468_v59 = vpop.f32.mrb[19].mxu0  ;;  %v1850_v60 = vpop.f32.mrb[15].mxu1 }
 0x2d5   : > { %v5349_v61 = vpack.c.bf16 %v4891_v57, %v1468_v59  ;;  %v6031_v62 = vpack.c.bf16 %v4961_v58, %v1850_v60 }
 0x2d7   : > { %v4894_v63 = vpop.f32.mrb[20].mxu0  ;;  %5350 = vmatprep.subr.bf16.mxu0 %v5349_v61  ;;  %v4964_v0 = vpop.f32.mrb[16].mxu1 }
 0x2d8   : > { %v1478_v1 = vpop.f32.mrb[21].mxu0  ;;  %5352 = vmatpush3.bf16.msra.mxu0 %v5349_v61  ;;  %v1860_v2 = vpop.f32.mrb[17].mxu1  ;;  %v4321_v61 = vld [vmem:[%s6534_s1 + $0x60] sm:$0xff] }
 0x2d9   : > { %v5353_v3 = vpack.c.bf16 %v4894_v63, %v1478_v1  ;;  %v6033_v4 = vpack.c.bf16 %v4964_v0, %v1860_v2  ;;  %v2257_v2 = vld [vmem:[%s6539_s6] sm:$0xff] }
 0x2db   : > { %v4897_v5 = vpop.f32.mrb[22].mxu0  ;;  %5354 = vmatprep.subr.bf16.mxu0 %v5353_v3  ;;  %v4967_v6 = vpop.f32.mrb[18].mxu1 }
 0x2dc   : > { %v1488_v9 = vpop.f32.mrb[23].mxu0  ;;  %5356 = vmatpush3.bf16.msra.mxu0 %v5353_v3  ;;  %v1870_v10 = vpop.f32.mrb[19].mxu1 }
 0x2dd   : > { %v5357_v11 = vpack.c.bf16 %v4897_v5, %v1488_v9  ;;  %v6035_v12 = vpack.c.bf16 %v4967_v6, %v1870_v10 }
 0x2df   : > { %v4900_v13 = vpop.f32.mrb[24].mxu0  ;;  %5358 = vmatprep.subr.bf16.mxu0 %v5357_v11  ;;  %v4970_v15 = vpop.f32.mrb[20].mxu1 }
 0x2e0   : > { %v1498_v16 = vpop.f32.mrb[25].mxu0  ;;  %5360 = vmatpush3.bf16.msra.mxu0 %v5357_v11  ;;  %v1880_v17 = vpop.f32.mrb[21].mxu1 }
 0x2e1   : > { %v5361_v18 = vpack.c.bf16 %v4900_v13, %v1498_v16  ;;  %v5401_v19 = vpack.c.bf16 %v4970_v15, %v1880_v17  ;;  %v2259_v15 = vld [vmem:[%s6539_s6 + $0x10] sm:$0xff] }
 0x2e3   : > { %5362 = vmatprep.subr.bf16.mxu0 %v5361_v18  ;;  %v4996_v20 = vpop.f32.mrb[22].mxu1 }
 0x2e4   : > { %5364 = vmatpush3.bf16.msra.mxu0 %v5361_v18  ;;  %v2041_v21 = vpop.f32.mrb[23].mxu1  ;;  %v2260_v18 = vld [vmem:[%s6539_s6 + $0x18] sm:$0xff] }
 0x2e5   : > { %v5409_v23 = vpack.c.bf16 %v4996_v20, %v2041_v21  ;;  %5366 = vmatprep.subr.bf16.mxu0 %v5757_v7  ;;  %v2261_v20 = vld [vmem:[%s6539_s6 + $0x20] sm:$0xff]  ;;  %v2262_v21 = vld [vmem:[%s6539_s6 + $0x28] sm:$0xff] }
 0x2e7   : > { %4918 = vmatmul.mubr.msk.f32.vlgmr.msra.gmra.mrb[26].mxu0 %vm1509_vm2, %v1508_v22  ;;  %v4999_v8 = vpop.f32.mrb[24].mxu1  ;;  %v2263_v22 = vld [vmem:[%s6539_s6 + $0x30] sm:$0xff] }
 0x2e8   : > { %5368 = vmatpush3.bf16.msra.mxu0 %v5757_v7  ;;  %4924 = vmatprep.mubr.msk.f32.mxu0 %vm376_vm0, %v5948_v32  ;;  %v2051_v24 = vpop.f32.mrb[25].mxu1 }
 0x2e9   : > { %v5413_v25 = vpack.c.bf16 %v4999_v8, %v2051_v24  ;;  %v4285_v8 = vld [vmem:[%s6539_s6 + $0x40] sm:$0xff]  ;;  %v4286_v24 = vld [vmem:[%s6539_s6 + $0x48] sm:$0xff] }
 0x2eb   : > { %4925 = vmatmul.mubr.msk.f32.vlgmr.msra.gmra.mrb[28].mxu0 %vm376_vm0, %v5950_v34  ;;  %v5002_v26 = vpop.f32.mrb[26].mxu1 }
 0x2ec   : > { %4927 = vmatprep.mubr.msk.f32.mxu0 %vm376_vm0, %v5966_v40  ;;  %v2061_v27 = vpop.f32.mrb[27].mxu1 }
 0x2ed   : > { %v5417_v28 = vpack.c.bf16 %v5002_v26, %v2061_v27  ;;  %v4288_v26 = vld [vmem:[%s6539_s6 + $0x58] sm:$0xff]  ;;  %v4289_v27 = vld [vmem:[%s6539_s6 + $0x60] sm:$0xff] }
 0x2ef   : > { %4928 = vmatmul.mubr.msk.f32.gmra.mrb[30].mxu0 %vm376_vm0, %v5969_v42  ;;  %v5005_v29 = vpop.f32.mrb[28].mxu1 }
 0x2f0   : > { %4930 = vmatprep.mubr.msk.f32.mxu0 %vm376_vm0, %v5986_v48  ;;  %v2071_v7 = vpop.f32.mrb[29].mxu1  ;;  %v4268_v48 = vld [vmem:[%s6537_s4 + $0x38] sm:$0xff] }
 0x2f1   : > { %v5421_v30 = vpack.c.bf16 %v5005_v29, %v2071_v7  ;;  %v4291_v29 = vld [vmem:[%s6539_s6 + $0x70] sm:$0xff]  ;;  %v4292_v7 = vld [vmem:[%s6539_s6 + $0x78] sm:$0xff] }
 0x2f3   : > { %4931 = vmatmul.mubr.msk.f32.gmra.mrb[32].mxu0 %vm376_vm0, %v5988_v50  ;;  %v4282_v50 = vld [vmem:[%s6534_s1 + $0x48] sm:$0xff] }
 0x2f4   : > { %4933 = vmatprep.mubr.msk.f32.mxu0 %vm376_vm0, %v5998_v54  ;;  %v6095_v51 = vpack.c.bf16 %v4282_v50, %v4281_v49  ;;  %v6105_v54 = vpack.c.bf16 %v4302_v53, %v4301_v52  ;;  %v2171_v53 = vld [vmem:[%s6540_s7 + $0x18] sm:$0xff] }
 0x2f7   : > { %4934 = vmatmul.mubr.msk.f32.gmra.mrb[34].mxu0 %vm376_vm0, %v6000_v55  ;;  %v1377_v55 = vld [vmem:[%s6538_s5 + $0x8] sm:$0xff] }
 0x2f8   : > { %4952 = vmatprep.mubr.msk.f32.mxu0 %vm1509_vm2, %v4243_v31  ;;  %v4306_v31 = vld [vmem:[%s6539_s6 + $0x88] sm:$0xff] }
 0x3be   : > { %v4926_v32 = vpop.f32.mrb[28].mxu0 }
 0x3bf   : > { %v1659_v33 = vpop.f32.mrb[29].mxu0 }
 0x3c0   : > { %v5369_v34 = vpack.c.bf16 %v4926_v32, %v1659_v33  ;;  %v4307_v32 = vld [vmem:[%s6539_s6 + $0x90] sm:$0xff]  ;;  %v4308_v33 = vld [vmem:[%s6539_s6 + $0x98] sm:$0xff] }
 0x3c2   : > { %v4929_v35 = vpop.f32.mrb[30].mxu0  ;;  %5370 = vmatprep.subr.bf16.mxu0 %v5369_v34 }
 0x3c3   : > { %v1669_v36 = vpop.f32.mrb[31].mxu0  ;;  %5372 = vmatpush3.bf16.msra.mxu0 %v5369_v34  ;;  %v4309_v34 = vld [vmem:[%s6539_s6 + $0xa0] sm:$0xff] }
 0x3c4   : > { %v5373_v37 = vpack.c.bf16 %v4929_v35, %v1669_v36  ;;  %v4310_v35 = vld [vmem:[%s6539_s6 + $0xa8] sm:$0xff]  ;;  %v4311_v36 = vld [vmem:[%s6539_s6 + $0xb0] sm:$0xff] }
 0x3c6   : > { %v4932_v38 = vpop.f32.mrb[32].mxu0  ;;  %5374 = vmatprep.subr.bf16.mxu0 %v5373_v37 }
 0x3c7   : > { %v1679_v39 = vpop.f32.mrb[33].mxu0  ;;  %5376 = vmatpush3.bf16.msra.mxu0 %v5373_v37  ;;  %v4312_v37 = vld [vmem:[%s6539_s6 + $0xb8] sm:$0xff] }
 0x3c8   : > { %v5377_v40 = vpack.c.bf16 %v4932_v38, %v1679_v39  ;;  %v4325_v38 = vld [vmem:[%s6539_s6 + $0xc0] sm:$0xff]  ;;  %v4326_v39 = vld [vmem:[%s6539_s6 + $0xc8] sm:$0xff] }
 0x3ca   : > { %v4935_v41 = vpop.f32.mrb[34].mxu0  ;;  %5378 = vmatprep.subr.bf16.mxu0 %v5377_v40 }
 0x3cb   : > { %v1689_v42 = vpop.f32.mrb[35].mxu0  ;;  %5380 = vmatpush3.bf16.msra.mxu0 %v5377_v40  ;;  %v4327_v40 = vld [vmem:[%s6539_s6 + $0xd0] sm:$0xff] }
 0x3cc   : > { %v5381_v43 = vpack.c.bf16 %v4935_v41, %v1689_v42  ;;  %v4328_v41 = vld [vmem:[%s6539_s6 + $0xd8] sm:$0xff]  ;;  %v4329_v42 = vld [vmem:[%s6539_s6 + $0xe0] sm:$0xff] }
 0x3ce   : > { %5382 = vmatprep.subr.bf16.mxu0 %v5381_v43 }
 0x3cf   : > { %5384 = vmatpush3.bf16.msra.mxu0 %v5381_v43  ;;  %v4330_v43 = vld [vmem:[%s6539_s6 + $0xe8] sm:$0xff] }
 0x3d0   : > { %5390 = vmatprep.subr.bf16.mxu0 %v6031_v62 }
 0x3d2   : > { %4953 = vmatmul.mubr.msk.f32.vlgmr.msra.gmra.mrb[26].mxu0 %vm1509_vm2, %v4244_v44  ;;  %v4331_v44 = vld [vmem:[%s6539_s6 + $0xf0] sm:$0xff] }
 0x3d3   : > { %5392 = vmatpush3.bf16.msra.mxu0 %v6031_v62  ;;  %4987 = vmatprep.mubr.msk.f32.mxu0 %vm1509_vm2, %v4255_v45  ;;  %v4322_v62 = vld [vmem:[%s6534_s1 + $0x68] sm:$0xff]  ;;  %v4332_v45 = vld [vmem:[%s6539_s6 + $0xf8] sm:$0xff] }
 0x3d4   : > { %5394 = vmatprep.subr.bf16.mxu0 %v6033_v4  ;;  %v6120_v1 = vpack.c.bf16 %v4322_v62, %v4321_v61  ;;  %v2173_v61 = vld [vmem:[%s6540_s7 + $0x28] sm:$0xff]  ;;  %v2172_v62 = vld [vmem:[%s6540_s7 + $0x20] sm:$0xff] }
 0x3d7   : > { %5396 = vmatpush3.bf16.msra.mxu0 %v6033_v4 }
 0x3d8   : > { %5398 = vmatprep.subr.bf16.mxu0 %v6035_v12 }
 0x3db   : > { %5400 = vmatpush3.bf16.msra.mxu0 %v6035_v12 }
 0x3dc   : > { %5402 = vmatprep.subr.bf16.mxu0 %v5401_v19 }
 0x3df   : > { %5404 = vmatpush3.bf16.msra.mxu0 %v5401_v19 }
 0x3e0   : > { %5410 = vmatprep.subr.bf16.mxu0 %v5409_v23 }
 0x3e2   : > { %4988 = vmatmul.mubr.msk.f32.vlgmr.msra.gmra.mrb[26].mxu0 %vm1509_vm2, %v4256_v46  ;;  %v2169_v46 = vld [vmem:[%s6540_s7 + $0x8] sm:$0xff] }
 0x3e3   : > { %5412 = vmatpush3.bf16.msra.mxu0 %v5409_v23  ;;  %5022 = vmatprep.mubr.msk.f32.mxu0 %vm1509_vm2, %v4267_v47  ;;  %v2264_v23 = vld [vmem:[%s6539_s6 + $0x38] sm:$0xff]  ;;  %v2168_v47 = vld [vmem:[%s6540_s7] sm:$0xff] }
 0x3e4   : > { %5414 = vmatprep.subr.bf16.mxu0 %v5413_v25 }
 0x3e7   : > { %5416 = vmatpush3.bf16.msra.mxu0 %v5413_v25  ;;  %v4287_v25 = vld [vmem:[%s6539_s6 + $0x50] sm:$0xff] }
 0x3e8   : > { %5418 = vmatprep.subr.bf16.mxu0 %v5417_v28 }
 0x3eb   : > { %5420 = vmatpush3.bf16.msra.mxu0 %v5417_v28  ;;  %v4290_v28 = vld [vmem:[%s6539_s6 + $0x68] sm:$0xff] }
 0x3ec   : > { %5422 = vmatprep.subr.bf16.mxu0 %v5421_v30 }
 0x3ef   : > { %5424 = vmatpush3.bf16.msra.mxu0 %v5421_v30  ;;  %v4305_v30 = vld [vmem:[%s6539_s6 + $0x80] sm:$0xff] }
 0x3f0   : > { %5434 = vmatprep.subr.bf16.mxu0 %v6095_v51 }
 0x3f2   : > { %5023 = vmatmul.mubr.msk.f32.vlgmr.msra.gmra.mrb[26].mxu0 %vm1509_vm2, %v4268_v48 }
 0x3f3   : > { %5436 = vmatpush3.bf16.msra.mxu0 %v6095_v51 }
 0x3f4   : > { %5442 = vmatprep.subr.bf16.mxu0 %v6105_v54 }
 0x4c5   : > { %v5024_v57 = vpop.f32.mrb[26].mxu0 }
 0x4c6   : > { %v5545_v58 = vadd.f32 %v5024_v57, %v1377_v55  ;;  %v2155_v59 = vpop.f32.mrb[27].mxu0 }
 0x4c7   : > { %v5546_v60 = vadd.f32 %v2155_v59, %v1376_v56 }
 0x4c8   : > { %v2167_v0 = vmax.f32 %v5545_v58, 0.0 }
 0x4c9   : > { %v2166_v63 = vmax.f32 %v5546_v60, 0.0 }
 0x4cb   : > { %5029 = vmatprep.mubr.msk.f32.mxu1 %vm376_vm0, %v2166_v63  ;;  %5052 = vmatprep.mubr.msk.f32.mxu0 %vm376_vm0, %v2166_v63 }
 0x4cc   : > { %5030 = vmatmul.mubr.msk.f32.vlgmr.msra.gmra.mrb[30].mxu1 %vm376_vm0, %v2167_v0  ;;  %5053 = vmatmul.mubr.msk.f32.vlgmr.msra.gmra.mrb[36].mxu0 %vm376_vm0, %v2167_v0 }
 0x4cd   : > { %5444 = vmatpush3.bf16.msra.mxu0 %v6105_v54  ;;  %5075 = vmatprep.mubr.msk.f32.mxu0 %vm376_vm0, %v2166_v63 }
 0x4ce   : > { %5450 = vmatprep.subr.bf16.mxu0 %v6120_v1  ;;  %5036 = vmatprep.mubr.msk.f32.mxu1 %vm376_vm0, %v2257_v2 }
 0x4d0   : > { %5076 = vmatmul.mubr.msk.f32.vlgmr.msra.gmra.mrb[38].mxu0 %vm376_vm0, %v2167_v0 }
 0x4d1   : > { %5452 = vmatpush3.bf16.msra.mxu0 %v6120_v1  ;;  %5098 = vmatprep.mubr.msk.f32.mxu0 %vm376_vm0, %v2166_v63 }
 0x4d2   : > { %5458 = vmatprep.subr.bf16.mxu0 %v5778_v14 }
 0x4d4   : > { %5099 = vmatmul.mubr.msk.f32.vlgmr.msra.gmra.mrb[40].mxu0 %vm376_vm0, %v2167_v0 }
 0x4d5   : > { %5460 = vmatpush3.bf16.msra.mxu0 %v5778_v14  ;;  %v2258_v14 = vld [vmem:[%s6539_s6 + $0x8] sm:$0xff] }
 0x59f   : > { %v5031_v3 = vpop.f32.mrb[30].mxu1  ;;  %v5054_v4 = vpop.f32.mrb[36].mxu0 }
 0x5a0   : > { %v2248_v5 = vpop.f32.mrb[31].mxu1  ;;  %v2471_v6 = vpop.f32.mrb[37].mxu0 }
 0x5a1   : > { %v5429_v9 = vpack.c.bf16 %v5031_v3, %v2248_v5  ;;  %v5437_v10 = vpack.c.bf16 %v5054_v4, %v2471_v6  ;;  %v2175_v6 = vld [vmem:[%s6540_s7 + $0x38] sm:$0xff] }
 0x5a3   : > { %5430 = vmatprep.subr.bf16.mxu1 %v5429_v9  ;;  %v5077_v11 = vpop.f32.mrb[38].mxu0 }
 0x5a4   : > { %5432 = vmatpush3.bf16.msra.mxu1 %v5429_v9  ;;  %v2695_v12 = vpop.f32.mrb[39].mxu0 }
 0x5a5   : > { %v5445_v13 = vpack.c.bf16 %v5077_v11, %v2695_v12  ;;  %5438 = vmatprep.subr.bf16.mxu1 %v5437_v10 }
 0x5a7   : > { %5037 = vmatmul.mubr.msk.f32.vlgmr.msra.gmra.mrb[32].mxu1 %vm376_vm0, %v2258_v14  ;;  %v5100_v16 = vpop.f32.mrb[40].mxu0 }
 0x5a8   : > { %5440 = vmatpush3.bf16.msra.mxu1 %v5437_v10  ;;  %v2919_v17 = vpop.f32.mrb[41].mxu0  ;;  %5039 = vmatprep.mubr.msk.f32.mxu1 %vm376_vm0, %v2259_v15 }
 0x5a9   : > { %v5453_v19 = vpack.c.bf16 %v5100_v16, %v2919_v17  ;;  %5446 = vmatprep.subr.bf16.mxu1 %v5445_v13  ;;  %v3217_v17 = vld [vmem:[%s6541_s8] sm:$0xff] }
 0x5ab   : > { %5040 = vmatmul.mubr.msk.f32.gmra.mrb[34].mxu1 %vm376_vm0, %v2260_v18 }
 0x5ac   : > { %5042 = vmatprep.mubr.msk.f32.mxu1 %vm376_vm0, %v2261_v20 }
 0x5af   : > { %5043 = vmatmul.mubr.msk.f32.gmra.mrb[36].mxu1 %vm376_vm0, %v2262_v21 }
 0x5b0   : > { %5045 = vmatprep.mubr.msk.f32.mxu1 %vm376_vm0, %v2263_v22 }
 0x5b3   : > { %5046 = vmatmul.mubr.msk.f32.gmra.mrb[38].mxu1 %vm376_vm0, %v2264_v23 }
 0x5b4   : > { %5059 = vmatprep.mubr.msk.f32.mxu1 %vm376_vm0, %v4285_v8 }
 0x5b7   : > { %5060 = vmatmul.mubr.msk.f32.vlgmr.msra.gmra.mrb[32].mxu1 %vm376_vm0, %v4286_v24 }
 0x5b8   : > { %5448 = vmatpush3.bf16.msra.mxu1 %v5445_v13  ;;  %5062 = vmatprep.mubr.msk.f32.mxu1 %vm376_vm0, %v4287_v25 }
 0x5b9   : > { %5454 = vmatprep.subr.bf16.mxu1 %v5453_v19 }
 0x5bb   : > { %5063 = vmatmul.mubr.msk.f32.gmra.mrb[34].mxu1 %vm376_vm0, %v4288_v26 }
 0x5bc   : > { %5065 = vmatprep.mubr.msk.f32.mxu1 %vm376_vm0, %v4289_v27 }
 0x5bf   : > { %5066 = vmatmul.mubr.msk.f32.gmra.mrb[36].mxu1 %vm376_vm0, %v4290_v28 }
 0x5c0   : > { %5068 = vmatprep.mubr.msk.f32.mxu1 %vm376_vm0, %v4291_v29 }
 0x5c3   : > { %5069 = vmatmul.mubr.msk.f32.gmra.mrb[38].mxu1 %vm376_vm0, %v4292_v7 }
 0x5c4   : > { %5082 = vmatprep.mubr.msk.f32.mxu1 %vm376_vm0, %v4305_v30 }
 0x5c7   : > { %5083 = vmatmul.mubr.msk.f32.vlgmr.msra.gmra.mrb[32].mxu1 %vm376_vm0, %v4306_v31 }
 0x5c8   : > { %5456 = vmatpush3.bf16.msra.mxu1 %v5453_v19  ;;  %5085 = vmatprep.mubr.msk.f32.mxu1 %vm376_vm0, %v4307_v32 }
 0x5c9   : > { %5498 = vmatprep.subr.bf16.mxu1 %v6105_v54 }
 0x5cb   : > { %5086 = vmatmul.mubr.msk.f32.gmra.mrb[34].mxu1 %vm376_vm0, %v4308_v33 }
 0x5cc   : > { %5088 = vmatprep.mubr.msk.f32.mxu1 %vm376_vm0, %v4309_v34 }
 0x5cf   : > { %5089 = vmatmul.mubr.msk.f32.gmra.mrb[36].mxu1 %vm376_vm0, %v4310_v35 }
 0x5d0   : > { %5091 = vmatprep.mubr.msk.f32.mxu1 %vm376_vm0, %v4311_v36 }
 0x5d3   : > { %5092 = vmatmul.mubr.msk.f32.gmra.mrb[38].mxu1 %vm376_vm0, %v4312_v37 }
 0x5d4   : > { %5105 = vmatprep.mubr.msk.f32.mxu1 %vm376_vm0, %v4325_v38 }
 0x5d7   : > { %5106 = vmatmul.mubr.msk.f32.vlgmr.msra.gmra.mrb[32].mxu1 %vm376_vm0, %v4326_v39 }
 0x5d8   : > { %5108 = vmatprep.mubr.msk.f32.mxu1 %vm376_vm0, %v4327_v40  ;;  %5500 = vmatpush3.bf16.msra.mxu1 %v6105_v54  ;;  %v2170_v54 = vld [vmem:[%s6540_s7 + $0x10] sm:$0xff] }
 0x5d9   : > { %5518 = vmatprep.subr.bf16.mxu1 %v6120_v1 }
 0x5db   : > { %5109 = vmatmul.mubr.msk.f32.gmra.mrb[34].mxu1 %vm376_vm0, %v4328_v41 }
 0x5dc   : > { %5111 = vmatprep.mubr.msk.f32.mxu1 %vm376_vm0, %v4329_v42  ;;  %v3218_v42 = vld [vmem:[%s6541_s8 + $0x8] sm:$0xff] }
 0x5df   : > { %5112 = vmatmul.mubr.msk.f32.gmra.mrb[36].mxu1 %vm376_vm0, %v4330_v43 }
 0x5e0   : > { %5114 = vmatprep.mubr.msk.f32.mxu1 %vm376_vm0, %v4331_v44  ;;  %v3219_v44 = vld [vmem:[%s6541_s8 + $0x10] sm:$0xff] }
 0x5e3   : > { %5115 = vmatmul.mubr.msk.f32.gmra.mrb[38].mxu1 %vm376_vm0, %v4332_v45 }
 0x6aa   : > { %v5107_v48 = vpop.f32.mrb[32].mxu1 }
 0x6ab   : > { %v5547_v49 = vadd.f32 %v5107_v48, %v2169_v46  ;;  %v3027_v50 = vpop.f32.mrb[33].mxu1 }
 0x6ac   : > { %v5548_v52 = vadd.f32 %v3027_v50, %v2168_v47  ;;  %v3220_v47 = vld [vmem:[%s6541_s8 + $0x18] sm:$0xff] }
 0x6ad   : > { %v6280_v57 = vmax.f32 %v5547_v49, 0.0  ;;  %v3221_v49 = vld [vmem:[%s6541_s8 + $0x20] sm:$0xff] }
 0x6ae   : > { %v6278_v55 = vmax.f32 %v5548_v52, 0.0  ;;  %v5110_v56 = vpop.f32.mrb[34].mxu1 }
 0x6af   : > { %v5549_v58 = vadd.f32 %v5110_v56, %v2171_v53  ;;  %v3037_v59 = vpop.f32.mrb[35].mxu1 }
 0x6b0   : > { %v5550_v60 = vadd.f32 %v3037_v59, %v2170_v54  ;;  %5121 = vmatprep.mubr.msk.f32.mxu0 %vm376_vm0, %v6278_v55  ;;  %5203 = vmatprep.mubr.msk.f32.mxu1 %vm376_vm0, %v6278_v55 }
 0x6b1   : > { %5122 = vmatmul.mubr.msk.f32.vlgmr.msra.gmra.mrb[42].mxu0 %vm376_vm0, %v6280_v57  ;;  %5204 = vmatmul.mubr.msk.f32.vlgmr.msra.gmra.mrb[40].mxu1 %vm376_vm0, %v6280_v57  ;;  %v6299_v2 = vmax.f32 %v5549_v58, 0.0 }
 0x6b2   : > { %v6296_v63 = vmax.f32 %v5550_v60, 0.0  ;;  %v5113_v0 = vpop.f32.mrb[36].mxu1  ;;  %5520 = vmatpush3.bf16.msra.mxu1 %v6120_v1  ;;  %v2174_v1 = vld [vmem:[%s6540_s7 + $0x30] sm:$0xff] }
 0x6b3   : > { %v5551_v3 = vadd.f32 %v5113_v0, %v2173_v61  ;;  %v3047_v4 = vpop.f32.mrb[37].mxu1 }
 0x6b4   : > { %v5552_v5 = vadd.f32 %v3047_v4, %v2172_v62  ;;  %5124 = vmatprep.mubr.msk.f32.mxu0 %vm376_vm0, %v6296_v63  ;;  %5206 = vmatprep.mubr.msk.f32.mxu1 %vm376_vm0, %v6296_v63 }
 0x6b5   : > { %5125 = vmatmul.mubr.msk.f32.gmra.mrb[44].mxu0 %vm376_vm0, %v6299_v2  ;;  %5207 = vmatmul.mubr.msk.f32.gmra.mrb[42].mxu1 %vm376_vm0, %v6299_v2  ;;  %v6317_v11 = vmax.f32 %v5551_v3, 0.0 }
 0x6b6   : > { %v6315_v9 = vmax.f32 %v5552_v5, 0.0  ;;  %v5116_v10 = vpop.f32.mrb[38].mxu1 }
 0x6b7   : > { %v5553_v12 = vadd.f32 %v5116_v10, %v2175_v6  ;;  %v3057_v14 = vpop.f32.mrb[39].mxu1  ;;  %v4366_v10 = vld [vmem:[%s6541_s8 + $0x48] sm:$0xff] }
 0x6b8   : > { %v5554_v13 = vadd.f32 %v3057_v14, %v2174_v1  ;;  %5127 = vmatprep.mubr.msk.f32.mxu0 %vm376_vm0, %v6315_v9  ;;  %5209 = vmatprep.mubr.msk.f32.mxu1 %vm376_vm0, %v6315_v9  ;;  %v4364_v1 = vld [vmem:[%s6541_s8 + $0x38] sm:$0xff]  ;;  %v4383_v14 = vld [vmem:[%s6541_s8 + $0x60] sm:$0xff] }
 0x6b9   : > { %5128 = vmatmul.mubr.msk.f32.gmra.mrb[46].mxu0 %vm376_vm0, %v6317_v11  ;;  %5210 = vmatmul.mubr.msk.f32.gmra.mrb[44].mxu1 %vm376_vm0, %v6317_v11  ;;  %v6329_v16 = vmax.f32 %v5553_v12, 0.0  ;;  %v4368_v12 = vld [vmem:[%s6541_s8 + $0x58] sm:$0xff] }
 0x6ba   : > { %v6327_v15 = vmax.f32 %v5554_v13, 0.0  ;;  %v4384_v13 = vld [vmem:[%s6541_s8 + $0x68] sm:$0xff] }
 0x6bc   : > { %5130 = vmatprep.mubr.msk.f32.mxu0 %vm376_vm0, %v6327_v15  ;;  %5212 = vmatprep.mubr.msk.f32.mxu1 %vm376_vm0, %v6327_v15 }
 0x6bd   : > { %5131 = vmatmul.mubr.msk.f32.gmra.mrb[48].mxu0 %vm376_vm0, %v6329_v16  ;;  %5213 = vmatmul.mubr.msk.f32.gmra.mrb[46].mxu1 %vm376_vm0, %v6329_v16 }
 0x6be   : > { %5244 = vmatprep.mubr.msk.f32.mxu1 %vm376_vm0, %v6278_v55  ;;  %5149 = vmatprep.mubr.msk.f32.mxu0 %vm1509_vm2, %v3217_v17  ;;  %v4387_v17 = vld [vmem:[%s6541_s8 + $0x80] sm:$0xff] }
 0x6c1   : > { %5245 = vmatmul.mubr.msk.f32.vlgmr.msra.gmra.mrb[48].mxu1 %vm376_vm0, %v6280_v57 }
 0x6c2   : > { %5247 = vmatprep.mubr.msk.f32.mxu1 %vm376_vm0, %v6296_v63 }
 0x6c5   : > { %5248 = vmatmul.mubr.msk.f32.gmra.mrb[50].mxu1 %vm376_vm0, %v6299_v2 }
 0x6c6   : > { %5250 = vmatprep.mubr.msk.f32.mxu1 %vm376_vm0, %v6315_v9 }
 0x6c9   : > { %5251 = vmatmul.mubr.msk.f32.gmra.mrb[52].mxu1 %vm376_vm0, %v6317_v11 }
 0x6ca   : > { %5253 = vmatprep.mubr.msk.f32.mxu1 %vm376_vm0, %v6327_v15 }
 0x6cd   : > { %5254 = vmatmul.mubr.msk.f32.gmra.mrb[54].mxu1 %vm376_vm0, %v6329_v16 }
 0x784   : > { %v5123_v18 = vpop.f32.mrb[42].mxu0  ;;  %v5205_v19 = vpop.f32.mrb[40].mxu1 }
 0x785   : > { %v3178_v20 = vpop.f32.mrb[43].mxu0  ;;  %v3639_v21 = vpop.f32.mrb[41].mxu1 }
 0x786   : > { %v5461_v22 = vpack.c.bf16 %v5123_v18, %v3178_v20  ;;  %v6359_v23 = vpack.c.bf16 %v5205_v19, %v3639_v21  ;;  %v4388_v18 = vld [vmem:[%s6541_s8 + $0x88] sm:$0xff]  ;;  %v4403_v19 = vld [vmem:[%s6541_s8 + $0x90] sm:$0xff]  ;;  %v4404_v20 = vld [vmem:[%s6541_s8 + $0x98] sm:$0xff] }
 0x787   : > { %v4405_v21 = vld [vmem:[%s6541_s8 + $0xa0] sm:$0xff] }
 0x788   : > { %v5126_v8 = vpop.f32.mrb[44].mxu0  ;;  %5462 = vmatprep.subr.bf16.mxu0 %v5461_v22  ;;  %v5208_v24 = vpop.f32.mrb[42].mxu1 }
 0x789   : > { %v3188_v25 = vpop.f32.mrb[45].mxu0  ;;  %5464 = vmatpush3.bf16.msra.mxu0 %v5461_v22  ;;  %v3649_v26 = vpop.f32.mrb[43].mxu1  ;;  %v4406_v22 = vld [vmem:[%s6541_s8 + $0xa8] sm:$0xff] }
 0x78a   : > { %v5465_v27 = vpack.c.bf16 %v5126_v8, %v3188_v25  ;;  %v6361_v28 = vpack.c.bf16 %v5208_v24, %v3649_v26  ;;  %v4408_v8 = vld [vmem:[%s6541_s8 + $0xb8] sm:$0xff]  ;;  %v3083_v24 = vld [vmem:[%s6542_s9 + $0x8] sm:$0xff]  ;;  %v3082_v25 = vld [vmem:[%s6542_s9] sm:$0xff] }
 0x78c   : > { %v5129_v29 = vpop.f32.mrb[46].mxu0  ;;  %5466 = vmatprep.subr.bf16.mxu0 %v5465_v27  ;;  %v5211_v7 = vpop.f32.mrb[44].mxu1 }
 0x78d   : > { %v3198_v30 = vpop.f32.mrb[47].mxu0  ;;  %5468 = vmatpush3.bf16.msra.mxu0 %v5465_v27  ;;  %v3659_v31 = vpop.f32.mrb[45].mxu1 }
 0x78e   : > { %v5469_v32 = vpack.c.bf16 %v5129_v29, %v3198_v30  ;;  %v6363_v33 = vpack.c.bf16 %v5211_v7, %v3659_v31  ;;  %v3085_v7 = vld [vmem:[%s6542_s9 + $0x18] sm:$0xff]  ;;  %v3084_v31 = vld [vmem:[%s6542_s9 + $0x10] sm:$0xff] }
 0x790   : > { %v5132_v34 = vpop.f32.mrb[48].mxu0  ;;  %5470 = vmatprep.subr.bf16.mxu0 %v5469_v32  ;;  %v5214_v35 = vpop.f32.mrb[46].mxu1 }
 0x791   : > { %v3208_v36 = vpop.f32.mrb[49].mxu0  ;;  %5472 = vmatpush3.bf16.msra.mxu0 %v5469_v32  ;;  %v3669_v37 = vpop.f32.mrb[47].mxu1 }
 0x792   : > { %v5473_v38 = vpack.c.bf16 %v5132_v34, %v3208_v36  ;;  %v6365_v39 = vpack.c.bf16 %v5214_v35, %v3669_v37 }
 0x794   : > { %5474 = vmatprep.subr.bf16.mxu0 %v5473_v38  ;;  %v5246_v40 = vpop.f32.mrb[48].mxu1 }
 0x795   : > { %5476 = vmatpush3.bf16.msra.mxu0 %v5473_v38  ;;  %v3870_v41 = vpop.f32.mrb[49].mxu1 }
 0x796   : > { %v6370_v43 = vpack.c.bf16 %v5246_v40, %v3870_v41  ;;  %5478 = vmatprep.subr.bf16.mxu0 %v6095_v51  ;;  %v3086_v41 = vld [vmem:[%s6542_s9 + $0x20] sm:$0xff] }
 0x798   : > { %5150 = vmatmul.mubr.msk.f32.vlgmr.msra.gmra.mrb[50].mxu0 %vm1509_vm2, %v3218_v42  ;;  %v5249_v45 = vpop.f32.mrb[50].mxu1 }
 0x799   : > { %5480 = vmatpush3.bf16.msra.mxu0 %v6095_v51  ;;  %v3880_v46 = vpop.f32.mrb[51].mxu1  ;;  %5152 = vmatprep.mubr.msk.f32.mxu0 %vm1509_vm2, %v3219_v44  ;;  %v3222_v51 = vld [vmem:[%s6541_s8 + $0x28] sm:$0xff] }
 0x79a   : > { %v6382_v48 = vpack.c.bf16 %v5249_v45, %v3880_v46 }
 0x79c   : > { %5153 = vmatmul.mubr.msk.f32.gmra.mrb[52].mxu0 %vm1509_vm2, %v3220_v47  ;;  %v5252_v50 = vpop.f32.mrb[52].mxu1 }
 0x79d   : > { %v3890_v52 = vpop.f32.mrb[53].mxu1  ;;  %5155 = vmatprep.mubr.msk.f32.mxu0 %vm1509_vm2, %v3221_v49 }
 0x79e   : > { %v6392_v53 = vpack.c.bf16 %v5252_v50, %v3890_v52 }
 0x7a0   : > { %5156 = vmatmul.mubr.msk.f32.gmra.mrb[54].mxu0 %vm1509_vm2, %v3222_v51  ;;  %v5255_v54 = vpop.f32.mrb[54].mxu1 }
 0x7a1   : > { %5162 = vmatprep.mubr.msk.f32.mxu0 %vm376_vm0, %v6278_v55  ;;  %v3900_v56 = vpop.f32.mrb[55].mxu1  ;;  %v4363_v55 = vld [vmem:[%s6541_s8 + $0x30] sm:$0xff] }
 0x7a2   : > { %v6397_v58 = vpack.c.bf16 %v5255_v54, %v3900_v56 }
 0x7a4   : > { %5163 = vmatmul.mubr.msk.f32.vlgmr.msra.gmra.mrb[56].mxu0 %vm376_vm0, %v6280_v57 }
 0x7a5   : > { %5165 = vmatprep.mubr.msk.f32.mxu0 %vm376_vm0, %v6296_v63 }
 0x7a8   : > { %5166 = vmatmul.mubr.msk.f32.gmra.mrb[58].mxu0 %vm376_vm0, %v6299_v2 }
 0x7a9   : > { %5168 = vmatprep.mubr.msk.f32.mxu0 %vm376_vm0, %v6315_v9  ;;  %v4365_v9 = vld [vmem:[%s6541_s8 + $0x40] sm:$0xff] }
 0x7ac   : > { %5169 = vmatmul.mubr.msk.f32.gmra.mrb[60].mxu0 %vm376_vm0, %v6317_v11  ;;  %v4367_v11 = vld [vmem:[%s6541_s8 + $0x50] sm:$0xff] }
 0x7ad   : > { %5171 = vmatprep.mubr.msk.f32.mxu0 %vm376_vm0, %v6327_v15  ;;  %v4385_v15 = vld [vmem:[%s6541_s8 + $0x70] sm:$0xff] }
 0x7b0   : > { %5172 = vmatmul.mubr.msk.f32.gmra.mrb[62].mxu0 %vm376_vm0, %v6329_v16  ;;  %v4386_v16 = vld [vmem:[%s6541_s8 + $0x78] sm:$0xff] }
 0x7b1   : > { %5190 = vmatprep.mubr.msk.f32.mxu0 %vm1509_vm2, %v4363_v55 }
 0x877   : > { %v5164_v57 = vpop.f32.mrb[56].mxu0 }
 0x878   : > { %v3408_v59 = vpop.f32.mrb[57].mxu0 }
 0x879   : > { %v5481_v60 = vpack.c.bf16 %v5164_v57, %v3408_v59 }
 0x87b   : > { %v5167_v61 = vpop.f32.mrb[58].mxu0  ;;  %5482 = vmatprep.subr.bf16.mxu0 %v5481_v60 }
 0x87c   : > { %v3418_v62 = vpop.f32.mrb[59].mxu0  ;;  %5484 = vmatpush3.bf16.msra.mxu0 %v5481_v60 }
 0x87d   : > { %v5485_v63 = vpack.c.bf16 %v5167_v61, %v3418_v62 }
 0x87f   : > { %v5170_v0 = vpop.f32.mrb[60].mxu0  ;;  %5486 = vmatprep.subr.bf16.mxu0 %v5485_v63 }
 0x880   : > { %v3428_v2 = vpop.f32.mrb[61].mxu0  ;;  %5488 = vmatpush3.bf16.msra.mxu0 %v5485_v63 }
 0x881   : > { %v5489_v3 = vpack.c.bf16 %v5170_v0, %v3428_v2 }
 0x883   : > { %v5173_v4 = vpop.f32.mrb[62].mxu0  ;;  %5490 = vmatprep.subr.bf16.mxu0 %v5489_v3 }
 0x884   : > { %v3438_v5 = vpop.f32.mrb[63].mxu0  ;;  %5492 = vmatpush3.bf16.msra.mxu0 %v5489_v3 }
 0x885   : > { %v5493_v6 = vpack.c.bf16 %v5173_v4, %v3438_v5 }
 0x887   : > { %5494 = vmatprep.subr.bf16.mxu0 %v5493_v6 }
 0x888   : > { %5496 = vmatpush3.bf16.msra.mxu0 %v5493_v6 }
 0x889   : > { %5502 = vmatprep.subr.bf16.mxu0 %v6359_v23 }
 0x88b   : > { %5191 = vmatmul.mubr.msk.f32.vlgmr.msra.gmra.mrb[50].mxu0 %vm1509_vm2, %v4364_v1 }
 0x88c   : > { %5504 = vmatpush3.bf16.msra.mxu0 %v6359_v23  ;;  %5193 = vmatprep.mubr.msk.f32.mxu0 %vm1509_vm2, %v4365_v9  ;;  %v4407_v23 = vld [vmem:[%s6541_s8 + $0xb0] sm:$0xff] }
 0x88d   : > { %5506 = vmatprep.subr.bf16.mxu0 %v6361_v28 }
 0x88f   : > { %5194 = vmatmul.mubr.msk.f32.gmra.mrb[52].mxu0 %vm1509_vm2, %v4366_v10 }
 0x890   : > { %5508 = vmatpush3.bf16.msra.mxu0 %v6361_v28  ;;  %5196 = vmatprep.mubr.msk.f32.mxu0 %vm1509_vm2, %v4367_v11 }
 0x891   : > { %5510 = vmatprep.subr.bf16.mxu0 %v6363_v33 }
 0x893   : > { %5197 = vmatmul.mubr.msk.f32.gmra.mrb[54].mxu0 %vm1509_vm2, %v4368_v12 }
 0x894   : > { %5512 = vmatpush3.bf16.msra.mxu0 %v6363_v33  ;;  %5231 = vmatprep.mubr.msk.f32.mxu0 %vm1509_vm2, %v4383_v14 }
 0x895   : > { %5514 = vmatprep.subr.bf16.mxu0 %v6365_v39 }
 0x898   : > { %5516 = vmatpush3.bf16.msra.mxu0 %v6365_v39  ;;  %v3087_v39 = vld [vmem:[%s6542_s9 + $0x28] sm:$0xff] }
 0x899   : > { %5522 = vmatprep.subr.bf16.mxu0 %v6370_v43 }
 0x89b   : > { %5232 = vmatmul.mubr.msk.f32.vlgmr.msra.gmra.mrb[50].mxu0 %vm1509_vm2, %v4384_v13 }
 0x89c   : > { %5524 = vmatpush3.bf16.msra.mxu0 %v6370_v43  ;;  %5234 = vmatprep.mubr.msk.f32.mxu0 %vm1509_vm2, %v4385_v15 }
 0x89d   : > { %5526 = vmatprep.subr.bf16.mxu0 %v6382_v48 }
 0x89f   : > { %5235 = vmatmul.mubr.msk.f32.gmra.mrb[52].mxu0 %vm1509_vm2, %v4386_v16 }
 0x8a0   : > { %5528 = vmatpush3.bf16.msra.mxu0 %v6382_v48  ;;  %5237 = vmatprep.mubr.msk.f32.mxu0 %vm1509_vm2, %v4387_v17 }
 0x8a1   : > { %5530 = vmatprep.subr.bf16.mxu0 %v6392_v53 }
 0x8a3   : > { %5238 = vmatmul.mubr.msk.f32.gmra.mrb[54].mxu0 %vm1509_vm2, %v4388_v18 }
 0x8a4   : > { %5532 = vmatpush3.bf16.msra.mxu0 %v6392_v53  ;;  %5272 = vmatprep.mubr.msk.f32.mxu0 %vm1509_vm2, %v4403_v19 }
 0x8a5   : > { %5534 = vmatprep.subr.bf16.mxu0 %v6397_v58 }
 0x8a8   : > { %5536 = vmatpush3.bf16.msra.mxu0 %v6397_v58 }
 0x8ab   : > { %5273 = vmatmul.mubr.msk.f32.vlgmr.msra.gmra.mrb[50].mxu0 %vm1509_vm2, %v4404_v20 }
 0x8ac   : > { %5275 = vmatprep.mubr.msk.f32.mxu0 %vm1509_vm2, %v4405_v21 }
 0x8af   : > { %5276 = vmatmul.mubr.msk.f32.gmra.mrb[52].mxu0 %vm1509_vm2, %v4406_v22 }
 0x8b0   : > { %5278 = vmatprep.mubr.msk.f32.mxu0 %vm1509_vm2, %v4407_v23 }
 0x8b3   : > { %5279 = vmatmul.mubr.msk.f32.gmra.mrb[54].mxu0 %vm1509_vm2, %v4408_v8 }
 0x97e   : > { %v5274_v26 = vpop.f32.mrb[50].mxu0 }
 0x97f   : > { %v5555_v27 = vadd.f32 %v5274_v26, %v3083_v24  ;;  %v4000_v28 = vpop.f32.mrb[51].mxu0 }
 0x980   : > { %v5556_v29 = vadd.f32 %v4000_v28, %v3082_v25 }
 0x981   : > { %v4036_v30 = vsub.f32 0.0, %v5555_v27 }
 0x982   : > { %v4035_v32 = vsub.f32 0.0, %v5556_v29  ;;  %v5277_v33 = vpop.f32.mrb[52].mxu0 }
 0x983   : > { %v4043_v34 = vmul.f32 1.442695, %v4036_v30  ;;  %v5557_v35 = vadd.f32 %v5277_v33, %v3085_v7  ;;  %v4010_v36 = vpop.f32.mrb[53].mxu0 }
 0x984   : > { %v4041_v37 = vmul.f32 1.442695, %v4035_v32  ;;  %v5558_v38 = vadd.f32 %v4010_v36, %v3084_v31 }
 0x985   : > { %5642 = vpow2.f32 %v4043_v34  ;;  %v4038_v40 = vsub.f32 0.0, %v5557_v35 }
 0x986   : > { %5644 = vpow2.f32 %v4041_v37  ;;  %v4037_v42 = vsub.f32 0.0, %v5558_v38  ;;  %v5280_v43 = vpop.f32.mrb[54].mxu0 }
 0x987   : > { %v4047_v44 = vmul.f32 1.442695, %v4038_v40  ;;  %v5559_v45 = vadd.f32 %v5280_v43, %v3087_v39  ;;  %v4020_v46 = vpop.f32.mrb[55].mxu0 }
 0x988   : > { %v4045_v47 = vmul.f32 1.442695, %v4037_v42  ;;  %v5560_v48 = vadd.f32 %v4020_v46, %v3086_v41 }
 0x989   : > { %5646 = vpow2.f32 %v4047_v44  ;;  %v4040_v49 = vsub.f32 0.0, %v5559_v45 }
 0x98a   : > { %5648 = vpow2.f32 %v4045_v47  ;;  %v4039_v50 = vsub.f32 0.0, %v5560_v48 }
 0x98b   : > { %v4051_v52 = vmul.f32 1.442695, %v4040_v49 }
 0x98c   : > { %v4049_v51 = vmul.f32 1.442695, %v4039_v50 }
 0x98d   : > { %5650 = vpow2.f32 %v4051_v52 }
 0x98e   : > { %5652 = vpow2.f32 %v4049_v51 }
 0x98f   : > { %v5643_v53 = vpop.eup %5642 }
 0x990   : > { %v5645_v54 = vpop.eup %5644  ;;  %v4054_v56 = vadd.f32 1.0, %v5643_v53 }
 0x991   : > { %v4053_v58 = vadd.f32 1.0, %v5645_v54 }
 0x992   : > { %5654 = vrcp.f32 %v4054_v56 }
 0x993   : > { %v5647_v55 = vpop.eup %5646  ;;  %5656 = vrcp.f32 %v4053_v58 }
 0x994   : > { %v5649_v57 = vpop.eup %5648  ;;  %v4056_v59 = vadd.f32 1.0, %v5647_v55 }
 0x995   : > { %v4055_v60 = vadd.f32 1.0, %v5649_v57 }
 0x996   : > { %5658 = vrcp.f32 %v4056_v59 }
 0x997   : > { %v5651_v61 = vpop.eup %5650  ;;  %5660 = vrcp.f32 %v4055_v60 }
 0x998   : > { %v5653_v62 = vpop.eup %5652  ;;  %v4058_v63 = vadd.f32 1.0, %v5651_v61 }
 0x999   : > { %v4057_v0 = vadd.f32 1.0, %v5653_v62 }
 0x99a   : > { %5662 = vrcp.f32 %v4058_v63 }
 0x99b   : > { %5664 = vrcp.f32 %v4057_v0 }
 0x99c   : > { %v5655_v2 = vpop.eup %5654 }
 0x99d   : > { %v5657_v3 = vpop.eup %5656  ;;  %4072 = vst.msk [vmem:[%s359_s16 + $0x8] sm:$0xff] %vm376_vm0, %v5655_v2 }
 0x99e   : > { %4071 = vst.msk [vmem:[%s359_s16] sm:$0xff] %vm376_vm0, %v5657_v3 }
 0x9a0   : > { %v5659_v4 = vpop.eup %5658 }
 0x9a1   : > { %v5661_v5 = vpop.eup %5660  ;;  %4074 = vst.msk [vmem:[%s359_s16 + $0x18] sm:$0xff] %vm376_vm0, %v5659_v4 }
 0x9a2   : > { %4073 = vst.msk [vmem:[%s359_s16 + $0x10] sm:$0xff] %vm376_vm0, %v5661_v5 }
 0x9a4   : > { %v5663_v6 = vpop.eup %5662 }
 0x9a5   : > { %v5665_v1 = vpop.eup %5664  ;;  %4076 = vst.msk [vmem:[%s359_s16 + $0x28] sm:$0xff] %vm376_vm0, %v5663_v6 }
 0x9a6   : > { %4075 = vst.msk [vmem:[%s359_s16 + $0x20] sm:$0xff] %vm376_vm0, %v5665_v1 }
 0x9a7 PF: > { %s20_s13 = sadd.s32 1, %s5672_s13  }
 0x9a8   : > { %p17_p4 = scmp.ge.s32.totalorder %s20_s13, 4  }
 0x9aa   :  { %19 = sbr.rel (!%p17_p4) target bundleno = 1 (0x1), region = 108 }

</bundles_post_ra>
